<compile_context>
chip_gen: v7x
topology: tpu7x:2x2x1
jax: 0.10.0
libtpu: 0.0.40
codegen_flags: <defaults>
</compile_context>

<pallas_src>
import jax
import jax.numpy as jnp
from jax.experimental import pallas as pl
from jax.experimental.pallas import tpu as pltpu

_NEG_LARGE = -3.0e38  # plain Python float -> inlined literal (never a captured jnp const)


def _round_up(v, m):
    return (v + m - 1) // m * m


def _pick_tile_n(n, f, fo_pad):
    """Node-tile size: multiple of 256 (v6e/v7x MXU friendly), sized so the
    double-buffered bf16 x tiles + f32 y_aug temporaries stay well under the
    v5e 16 MiB scoped-VMEM default (and v7x's 64 MiB physical VMEM)."""
    per_row_bytes = 4 * f + 6 * (fo_pad + 128)  # 2x bf16 x (dbl-buf) + f32 y_aug + bf16 y
    tile = (6 * 1024 * 1024) // max(per_row_bytes, 1)
    tile = max(256, min(1024, (tile // 256) * 256))
    tile = min(tile, max(256, _round_up(n, 256)))  # don't grossly exceed the node count
    return tile


def _make_kernel(n, fo_pad, pad_seg, b_pad, tile_n):
    """Builds the two-pass kernel. All closed-over values are Python ints."""

    def kernel(batch_ref, x_ref, w_ref, bias_ref, out_ref, gate_ref, m_scr, s_scr):
        p = pl.program_id(0)  # 0: per-segment softmax stats, 1: apply + scatter
        t = pl.program_id(1)  # node-tile index

        # ---- shared per-tile prep (both passes) ------------------------------
        lane_ids = jax.lax.broadcasted_iota(jnp.int32, (1, tile_n), 1) + t * tile_n
        valid_row = lane_ids < n                                          # (1, tile_n)
        batch_row = jnp.where(valid_row, batch_ref[...], pad_seg)         # pad rows -> pad segment

        row_ids = jax.lax.broadcasted_iota(jnp.int32, (tile_n, 1), 0) + t * tile_n
        x_t = jnp.where(row_ids < n, x_ref[...], 0.0)                     # (tile_n, f) bf16, pad rows zeroed

        seg_ids = jax.lax.broadcasted_iota(jnp.int32, (b_pad, tile_n), 0)
        member = batch_row == seg_ids                                     # (b_pad, tile_n) one-hot bool
        member_f = member.astype(jnp.float32)

        def gate_logits_row(slab):
            # slab: (tile_n, 128) f32 with the gate logit in column 0.
            # (tile_n,128)->(128,tile_n) is an aligned f32 XLU transpose; row 0
            # gives the logits in lane-major (nodes-on-lanes) form.
            return jnp.transpose(slab)[0:1, :]                            # (1, tile_n)

        # ---- pass 0: online per-segment max / sum(exp) of gate logits --------
        @pl.when(p == 0)
        def _stats():
            @pl.when(t == 0)
            def _init():
                m_scr[...] = jnp.full_like(m_scr, _NEG_LARGE)
                s_scr[...] = jnp.zeros_like(s_scr)

            slab = jnp.dot(x_t, w_ref[:, fo_pad:],
                           preferred_element_type=jnp.float32) + bias_ref[:, fo_pad:]
            g_row = gate_logits_row(slab)                                 # (1, tile_n)

            m_tile = jnp.max(jnp.where(member, g_row, _NEG_LARGE),
                             axis=1, keepdims=True)                       # (b_pad, 1)
            m_new = jnp.maximum(m_scr[...], m_tile)
            alpha = jnp.exp(m_scr[...] - m_new)                           # rescale of previous sums
            node_m = jnp.sum(member_f * m_new, axis=0, keepdims=True)     # m_new[batch]  (1, tile_n)
            e_row = jnp.exp(g_row - node_m)                               # (1, tile_n)
            s_tile = jnp.sum(member_f * e_row, axis=1, keepdims=True)     # (b_pad, 1)
            s_scr[...] = alpha * s_scr[...] + s_tile
            m_scr[...] = m_new
            gate_ref[...] = g_row      # placeholder write; pass 1 overwrites

        # ---- pass 1: normalized gate + scatter_add(gate * nn(x)) -------------
        @pl.when(p == 1)
        def _apply():
            @pl.when(t == 0)
            def _zero():
                out_ref[...] = jnp.zeros_like(out_ref)

            y_aug = jnp.dot(x_t, w_ref[...],
                            preferred_element_type=jnp.float32) + bias_ref[...]
            g_row = gate_logits_row(y_aug[:, fo_pad:])                    # (1, tile_n)
            node_m = jnp.sum(member_f * m_scr[...], axis=0, keepdims=True)
            node_s = jnp.sum(member_f * s_scr[...], axis=0, keepdims=True)
            gate_row = jnp.exp(g_row - node_m) * pl.reciprocal(node_s, approx=True)
            gate_ref[...] = gate_row                                      # lane-dense gate output

            # scatter_add as one MXU matmul: fold the gate into the small one-hot mask.
            wm = (member_f * gate_row).astype(jnp.bfloat16)               # (b_pad, tile_n)
            y_bf = y_aug[:, :fo_pad].astype(jnp.bfloat16)                 # (tile_n, fo_pad)
            out_ref[...] += jax.lax.dot_general(
                wm, y_bf, dimension_numbers=(((1,), (0,)), ((), ())),
                preferred_element_type=jnp.float32)

    return kernel


def init_params(key, num_features):
    """Synthetic init matching torch Linear init; nn weight stored (in, out)."""
    f = num_features
    k1, k2, k3, k4 = jax.random.split(key, 4)
    bound = 1.0 / float(f) ** 0.5
    return {
        "wg": jax.random.uniform(k1, (f,), jnp.float32, -bound, bound),    # gate Linear(F,1) weight
        "bg": jax.random.uniform(k2, (), jnp.float32, -bound, bound),      # gate bias
        "wn": jax.random.uniform(k3, (f, f), jnp.float32, -bound, bound),  # nn Linear(F,F) weight (in,out)
        "b_nn": jax.random.uniform(k4, (f,), jnp.float32, -bound, bound),  # nn bias
    }


def prepare_kernel_params(params, num_features):
    """One-time packing: augmented weight [wn | gate column (128-lane group)],
    bf16 for the MXU; biases packed the same way, kept f32."""
    f = num_features
    fo_pad = _round_up(max(f, 128), 128)
    w_aug = jnp.zeros((f, fo_pad + 128), jnp.float32)
    w_aug = w_aug.at[:, :f].set(params["wn"])
    w_aug = w_aug.at[:, fo_pad].set(params["wg"])
    bias_aug = jnp.zeros((1, fo_pad + 128), jnp.float32)
    bias_aug = bias_aug.at[0, :f].set(params["b_nn"])
    bias_aug = bias_aug.at[0, fo_pad].set(params["bg"])
    return {"w_aug": w_aug.astype(jnp.bfloat16), "bias_aug": bias_aug,
            "num_features": f, "fo_pad": fo_pad}


def my_global_attention(x, batch, num_graphs, kparams):
    """MyGlobalAttention.forward(x, batch, size=num_graphs) -> (out, gate)."""
    n, f = x.shape
    fo_pad = kparams["fo_pad"]
    b = int(num_graphs)
    b_pad = _round_up(b + 1, 8)           # +1 reserves an isolated segment for padded rows
    tile_n = _pick_tile_n(n, f, fo_pad)
    num_tiles = pl.cdiv(n, tile_n)

    x_bf = x.astype(jnp.bfloat16)                      # bf16 MXU operands, f32 accumulation
    batch_row = batch.astype(jnp.int32).reshape(1, n)  # lane-major batch ids

    kernel = _make_kernel(n, fo_pad, b, b_pad, tile_n)

    flops = (2 * n * f * 128                    # pass-0 gate logits
             + 2 * n * f * (fo_pad + 128)       # pass-1 nn(x) + fused gate column
             + 2 * n * b_pad * fo_pad)          # scatter matmul
    bytes_accessed = (2 * n * f * 2 + f * (fo_pad + 128) * 2
                      + b_pad * fo_pad * 4 + 3 * n * 4)

    out_p, gate_p = pl.pallas_call(
        kernel,
        out_shape=(jax.ShapeDtypeStruct((b_pad, fo_pad), jnp.float32),
                   jax.ShapeDtypeStruct((1, n), jnp.float32)),
        grid=(2, num_tiles),
        in_specs=[
            pl.BlockSpec((1, tile_n), lambda p, t: (0, t)),            # batch ids (row)
            pl.BlockSpec((tile_n, f), lambda p, t: (t, 0)),            # x node tiles (bf16)
            pl.BlockSpec((f, fo_pad + 128), lambda p, t: (0, 0)),      # augmented weight (resident)
            pl.BlockSpec((1, fo_pad + 128), lambda p, t: (0, 0)),      # augmented bias (resident)
        ],
        out_specs=(
            pl.BlockSpec((b_pad, fo_pad), lambda p, t: (0, 0)),        # pooled output (VMEM-resident acc)
            pl.BlockSpec((1, tile_n), lambda p, t: (0, t)),            # gate (lane-dense row)
        ),
        scratch_shapes=[
            pltpu.VMEM((b_pad, 1), jnp.float32),   # running per-segment max
            pltpu.VMEM((b_pad, 1), jnp.float32),   # running per-segment sum(exp)
        ],
        compiler_params=pltpu.CompilerParams(
            dimension_semantics=("arbitrary", "arbitrary"),
            vmem_limit_bytes=32 * 1024 * 1024),
        cost_estimate=pl.CostEstimate(flops=int(flops),
                                      transcendentals=int(2 * n),
                                      bytes_accessed=int(bytes_accessed)),
    )(batch_row, x_bf, kparams["w_aug"], kparams["bias_aug"])

    return out_p[:b, :f], gate_p[0, :n][:, None]


def _reference(x, batch, num_graphs, params):
    """Pure-JAX f32 reference mirroring the PyTorch module."""
    g = jnp.sum(x * params["wg"][None, :], axis=1, keepdims=True) + params["bg"]
    y = x @ params["wn"] + params["b_nn"][None, :]
    g1 = g[:, 0]
    seg_max = jax.ops.segment_max(g1, batch, num_segments=num_graphs)
    e = jnp.exp(g1 - seg_max[batch])
    denom = jax.ops.segment_sum(e, batch, num_segments=num_graphs)
    a = e / denom[batch]
    out = jax.ops.segment_sum(a[:, None] * y, batch, num_segments=num_graphs)
    return out, a[:, None]


def _run_case(key, n, f, b):
    kx, kb, kp = jax.random.split(key, 3)
    x = jax.random.normal(kx, (n, f), jnp.float32)
    batch = jnp.sort(jax.random.randint(kb, (n,), 0, b)).astype(jnp.int32)
    params = init_params(kp, f)
    kparams = prepare_kernel_params(params, f)

    out, gate = my_global_attention(x, batch, b, kparams)
    out = jax.block_until_ready(out)
    gate = jax.block_until_ready(gate)

    ref_out, ref_gate = _reference(x, batch, b, params)
    assert out.shape == (b, f) and gate.shape == (n, 1)
    # bf16 MXU operands -> loosened tolerances (softmax/normalization kept f32).
    assert jnp.allclose(out, ref_out, atol=3e-2, rtol=3e-2), (
        float(jnp.max(jnp.abs(out - ref_out))))
    assert jnp.allclose(gate, ref_gate, atol=1e-2, rtol=2e-2), (
        float(jnp.max(jnp.abs(gate - ref_gate))))


if __name__ == "__main__":
    key = jax.random.PRNGKey(0)
    k1, k2 = jax.random.split(key)

    # Aligned case: 64 nodes, 128 features, 8 graphs.
    _run_case(k1, 64, 128, 8)
    # Ragged case exercising overhanging last tile + pad segment: N=37, F=96, B=5.
    _run_case(k2, 37, 96, 5)

    print("KERNEL_OK")
</pallas_src>

<mosaic_0001>
module attributes {stable_mosaic.version = 11 : i64} {
  func.func @kernel(%arg0: i32, %arg1: i32, %arg2: memref<1x256xi32, #tpu.memory_space<vmem>>, %arg3: memref<256x128xbf16, #tpu.memory_space<vmem>>, %arg4: memref<128x256xbf16, #tpu.memory_space<vmem>>, %arg5: memref<1x256xf32, #tpu.memory_space<vmem>>, %arg6: memref<16x128xf32, #tpu.memory_space<vmem>>, %arg7: memref<1x256xf32, #tpu.memory_space<vmem>>, %arg8: memref<16x1xf32, #tpu.memory_space<vmem>>, %arg9: memref<16x1xf32, #tpu.memory_space<vmem>>) attributes {dimension_semantics = [#tpu.dimension_semantics<arbitrary>, #tpu.dimension_semantics<arbitrary>], iteration_bounds = array<i64: 2, 1>, scalar_prefetch = 0 : i64, scratch_operands = 2 : i64, tpu.core_type = #tpu.core_type<tc>, window_params = [{transform_indices = @transform_0, window_bounds = array<i64: 1, 256>}, {transform_indices = @transform_1, window_bounds = array<i64: 256, 128>}, {pipeline_mode = #tpu.pipeline_mode<synchronous>, transform_indices = @transform_2, window_bounds = array<i64: 128, 256>}, {pipeline_mode = #tpu.pipeline_mode<synchronous>, transform_indices = @transform_3, window_bounds = array<i64: 1, 256>}, {pipeline_mode = #tpu.pipeline_mode<synchronous>, transform_indices = @transform_4, window_bounds = array<i64: 16, 128>}, {transform_indices = @transform_5, window_bounds = array<i64: 1, 256>}]} {
    %0 = tpu.iota {dimensions = array<i32: 1>} : vector<1x256xi32>
    %c256_i32 = arith.constant 256 : i32
    %1 = arith.muli %arg1, %c256_i32 : i32
    %2 = vector.broadcast %1 : i32 to vector<1x256xi32>
    %3 = arith.addi %0, %2 : vector<1x256xi32>
    %c64_i32 = arith.constant 64 : i32
    %4 = vector.broadcast %c64_i32 : i32 to vector<1x256xi32>
    %5 = arith.cmpi slt, %3, %4 : vector<1x256xi32>
    %c0 = arith.constant 0 : index
    %c0_0 = arith.constant 0 : index
    %6 = vector.load %arg2[%c0, %c0_0] : memref<1x256xi32, #tpu.memory_space<vmem>>, vector<1x256xi32>
    %c8_i32 = arith.constant 8 : i32
    %7 = vector.broadcast %c8_i32 : i32 to vector<1x256xi32>
    %8 = arith.select %5, %6, %7 : vector<1x256xi1>, vector<1x256xi32>
    %9 = tpu.iota {dimensions = array<i32: 0>} : vector<256x1xi32>
    %c256_i32_1 = arith.constant 256 : i32
    %10 = arith.muli %arg1, %c256_i32_1 : i32
    %11 = vector.broadcast %10 : i32 to vector<256x1xi32>
    %12 = arith.addi %9, %11 : vector<256x1xi32>
    %c64_i32_2 = arith.constant 64 : i32
    %13 = vector.broadcast %c64_i32_2 : i32 to vector<256x1xi32>
    %14 = arith.cmpi slt, %12, %13 : vector<256x1xi32>
    %c0_3 = arith.constant 0 : index
    %c0_4 = arith.constant 0 : index
    %15 = vector.load %arg3[%c0_3, %c0_4] : memref<256x128xbf16, #tpu.memory_space<vmem>>, vector<256x128xbf16>
    %cst = arith.constant 0.000000e+00 : f32
    %16 = arith.truncf %cst : f32 to bf16
    %17 = vector.shape_cast %14 : vector<256x1xi1> to vector<256x1xi1>
    %18 = vector.broadcast %17 : vector<256x1xi1> to vector<256x128xi1>
    %19 = vector.broadcast %16 : bf16 to vector<256x128xbf16>
    %20 = arith.select %18, %15, %19 : vector<256x128xi1>, vector<256x128xbf16>
    %21 = tpu.iota {dimensions = array<i32: 0>} : vector<16x256xi32>
    %22 = vector.broadcast %8 : vector<1x256xi32> to vector<16x256xi32>
    %23 = arith.cmpi eq, %22, %21 : vector<16x256xi32>
    %24 = arith.extui %23 : vector<16x256xi1> to vector<16x256xi32>
    %25 = arith.sitofp %24 : vector<16x256xi32> to vector<16x256xf32>
    %c0_i32 = arith.constant 0 : i32
    %26 = arith.cmpi eq, %arg0, %c0_i32 : i32
    %27 = arith.extui %26 : i1 to i32
    %c0_i32_5 = arith.constant 0 : i32
    %28 = arith.cmpi ne, %27, %c0_i32_5 : i32
    scf.if %28 {
      %c0_i32_7 = arith.constant 0 : i32
      %32 = arith.cmpi eq, %arg1, %c0_i32_7 : i32
      %33 = arith.extui %32 : i1 to i32
      %c0_i32_8 = arith.constant 0 : i32
      %34 = arith.cmpi ne, %33, %c0_i32_8 : i32
      scf.if %34 {
        %cst_29 = arith.constant -3.000000e+38 : f32
        %69 = vector.broadcast %cst_29 : f32 to vector<16x1xf32>
        %c0_30 = arith.constant 0 : index
        %c0_31 = arith.constant 0 : index
        %70 = vector.load %arg8[%c0_30, %c0_31] : memref<16x1xf32, #tpu.memory_space<vmem>>, vector<16x1xf32>
        tpu.vector_store %arg8[%c0_30, %c0_31], %69 {strides = array<i32>} : memref<16x1xf32, #tpu.memory_space<vmem>>, vector<16x1xf32>,
        %cst_32 = arith.constant 0.000000e+00 : f32
        %71 = vector.broadcast %cst_32 : f32 to vector<16x1xf32>
        %c0_33 = arith.constant 0 : index
        %c0_34 = arith.constant 0 : index
        %72 = vector.load %arg9[%c0_33, %c0_34] : memref<16x1xf32, #tpu.memory_space<vmem>>, vector<16x1xf32>
        tpu.vector_store %arg9[%c0_33, %c0_34], %71 {strides = array<i32>} : memref<16x1xf32, #tpu.memory_space<vmem>>, vector<16x1xf32>,
      } else {
      }
      %c0_9 = arith.constant 0 : index
      %c128 = arith.constant 128 : index
      %35 = vector.load %arg4[%c0_9, %c128] : memref<128x256xbf16, #tpu.memory_space<vmem>>, vector<128x128xbf16>
      %cst_10 = arith.constant dense<0.000000e+00> : vector<256x128xf32>
      %36 = tpu.matmul %20, %35, %cst_10 {dimension_numbers = #tpu.dot_dimension_numbers<[1], [0], [0], [1], [0, 0, 1, 1], [], []>} : vector<256x128xbf16>, vector<128x128xbf16>, vector<256x128xf32> -> vector<256x128xf32>
      %c0_11 = arith.constant 0 : index
      %c128_12 = arith.constant 128 : index
      %37 = vector.load %arg5[%c0_11, %c128_12] : memref<1x256xf32, #tpu.memory_space<vmem>>, vector<1x128xf32>
      %38 = vector.broadcast %37 : vector<1x128xf32> to vector<256x128xf32>
      %39 = arith.addf %36, %38 : vector<256x128xf32>
      %40 = tpu.transpose %39, [1, 0] : vector<256x128xf32> -> vector<128x256xf32>
      %41 = vector.extract_strided_slice %40 {offsets = [0, 0], sizes = [1, 256], strides = [1, 1]} : vector<128x256xf32> to vector<1x256xf32>
      %cst_13 = arith.constant -3.000000e+38 : f32
      %42 = vector.shape_cast %41 : vector<1x256xf32> to vector<1x256xf32>
      %43 = vector.broadcast %42 : vector<1x256xf32> to vector<16x256xf32>
      %44 = vector.broadcast %cst_13 : f32 to vector<16x256xf32>
      %45 = arith.select %23, %43, %44 : vector<16x256xi1>, vector<16x256xf32>
      %cst_14 = arith.constant dense<0xFF800000> : vector<16xf32>
      %46 = vector.multi_reduction <maximumf>, %45, %cst_14 [1] : vector<16x256xf32> to vector<16xf32>
      %47 = vector.shape_cast %46 : vector<16xf32> to vector<16x1xf32>
      %c0_15 = arith.constant 0 : index
      %c0_16 = arith.constant 0 : index
      %48 = vector.load %arg8[%c0_15, %c0_16] : memref<16x1xf32, #tpu.memory_space<vmem>>, vector<16x1xf32>
      %49 = arith.maximumf %48, %47 : vector<16x1xf32>
      %c0_17 = arith.constant 0 : index
      %c0_18 = arith.constant 0 : index
      %50 = vector.load %arg8[%c0_17, %c0_18] : memref<16x1xf32, #tpu.memory_space<vmem>>, vector<16x1xf32>
      %51 = arith.subf %50, %49 : vector<16x1xf32>
      %52 = math.exp %51 : vector<16x1xf32>
      %53 = vector.broadcast %49 : vector<16x1xf32> to vector<16x256xf32>
      %54 = arith.mulf %25, %53 : vector<16x256xf32>
      %cst_19 = arith.constant dense<0.000000e+00> : vector<256xf32>
      %55 = vector.multi_reduction <add>, %54, %cst_19 [0] : vector<16x256xf32> to vector<256xf32>
      %56 = vector.shape_cast %55 : vector<256xf32> to vector<1x256xf32>
      %57 = arith.subf %41, %56 : vector<1x256xf32>
      %58 = math.exp %57 : vector<1x256xf32>
      %59 = vector.broadcast %58 : vector<1x256xf32> to vector<16x256xf32>
      %60 = arith.mulf %25, %59 : vector<16x256xf32>
      %cst_20 = arith.constant dense<0.000000e+00> : vector<16xf32>
      %61 = vector.multi_reduction <add>, %60, %cst_20 [1] : vector<16x256xf32> to vector<16xf32>
      %62 = vector.shape_cast %61 : vector<16xf32> to vector<16x1xf32>
      %c0_21 = arith.constant 0 : index
      %c0_22 = arith.constant 0 : index
      %63 = vector.load %arg9[%c0_21, %c0_22] : memref<16x1xf32, #tpu.memory_space<vmem>>, vector<16x1xf32>
      %64 = arith.mulf %52, %63 : vector<16x1xf32>
      %65 = arith.addf %64, %62 : vector<16x1xf32>
      %c0_23 = arith.constant 0 : index
      %c0_24 = arith.constant 0 : index
      %66 = vector.load %arg9[%c0_23, %c0_24] : memref<16x1xf32, #tpu.memory_space<vmem>>, vector<16x1xf32>
      tpu.vector_store %arg9[%c0_23, %c0_24], %65 {strides = array<i32>} : memref<16x1xf32, #tpu.memory_space<vmem>>, vector<16x1xf32>,
      %c0_25 = arith.constant 0 : index
      %c0_26 = arith.constant 0 : index
      %67 = vector.load %arg8[%c0_25, %c0_26] : memref<16x1xf32, #tpu.memory_space<vmem>>, vector<16x1xf32>
      tpu.vector_store %arg8[%c0_25, %c0_26], %49 {strides = array<i32>} : memref<16x1xf32, #tpu.memory_space<vmem>>, vector<16x1xf32>,
      %c0_27 = arith.constant 0 : index
      %c0_28 = arith.constant 0 : index
      %68 = vector.load %arg7[%c0_27, %c0_28] : memref<1x256xf32, #tpu.memory_space<vmem>>, vector<1x256xf32>
      tpu.vector_store %arg7[%c0_27, %c0_28], %41 {strides = array<i32>} : memref<1x256xf32, #tpu.memory_space<vmem>>, vector<1x256xf32>,
    } else {
    }
    %c1_i32 = arith.constant 1 : i32
    %29 = arith.cmpi eq, %arg0, %c1_i32 : i32
    %30 = arith.extui %29 : i1 to i32
    %c0_i32_6 = arith.constant 0 : i32
    %31 = arith.cmpi ne, %30, %c0_i32_6 : i32
    scf.if %31 {
      %c0_i32_7 = arith.constant 0 : i32
      %32 = arith.cmpi eq, %arg1, %c0_i32_7 : i32
      %33 = arith.extui %32 : i1 to i32
      %c0_i32_8 = arith.constant 0 : i32
      %34 = arith.cmpi ne, %33, %c0_i32_8 : i32
      scf.if %34 {
        %cst_27 = arith.constant 0.000000e+00 : f32
        %67 = vector.broadcast %cst_27 : f32 to vector<16x128xf32>
        %c0_28 = arith.constant 0 : index
        %c0_29 = arith.constant 0 : index
        %68 = vector.load %arg6[%c0_28, %c0_29] : memref<16x128xf32, #tpu.memory_space<vmem>>, vector<16x128xf32>
        tpu.vector_store %arg6[%c0_28, %c0_29], %67 {strides = array<i32>} : memref<16x128xf32, #tpu.memory_space<vmem>>, vector<16x128xf32>,
      } else {
      }
      %c0_9 = arith.constant 0 : index
      %c0_10 = arith.constant 0 : index
      %35 = vector.load %arg4[%c0_9, %c0_10] : memref<128x256xbf16, #tpu.memory_space<vmem>>, vector<128x256xbf16>
      %cst_11 = arith.constant dense<0.000000e+00> : vector<256x256xf32>
      %36 = tpu.matmul %20, %35, %cst_11 {dimension_numbers = #tpu.dot_dimension_numbers<[1], [0], [0], [1], [0, 0, 1, 1], [], []>} : vector<256x128xbf16>, vector<128x256xbf16>, vector<256x256xf32> -> vector<256x256xf32>
      %c0_12 = arith.constant 0 : index
      %c0_13 = arith.constant 0 : index
      %37 = vector.load %arg5[%c0_12, %c0_13] : memref<1x256xf32, #tpu.memory_space<vmem>>, vector<1x256xf32>
      %38 = vector.broadcast %37 : vector<1x256xf32> to vector<256x256xf32>
      %39 = arith.addf %36, %38 : vector<256x256xf32>
      %40 = vector.extract_strided_slice %39 {offsets = [0, 128], sizes = [256, 128], strides = [1, 1]} : vector<256x256xf32> to vector<256x128xf32>
      %41 = tpu.transpose %40, [1, 0] : vector<256x128xf32> -> vector<128x256xf32>
      %42 = vector.extract_strided_slice %41 {offsets = [0, 0], sizes = [1, 256], strides = [1, 1]} : vector<128x256xf32> to vector<1x256xf32>
      %c0_14 = arith.constant 0 : index
      %c0_15 = arith.constant 0 : index
      %43 = vector.load %arg8[%c0_14, %c0_15] : memref<16x1xf32, #tpu.memory_space<vmem>>, vector<16x1xf32>
      %44 = vector.broadcast %43 : vector<16x1xf32> to vector<16x256xf32>
      %45 = arith.mulf %25, %44 : vector<16x256xf32>
      %cst_16 = arith.constant dense<0.000000e+00> : vector<256xf32>
      %46 = vector.multi_reduction <add>, %45, %cst_16 [0] : vector<16x256xf32> to vector<256xf32>
      %47 = vector.shape_cast %46 : vector<256xf32> to vector<1x256xf32>
      %c0_17 = arith.constant 0 : index
      %c0_18 = arith.constant 0 : index
      %48 = vector.load %arg9[%c0_17, %c0_18] : memref<16x1xf32, #tpu.memory_space<vmem>>, vector<16x1xf32>
      %49 = vector.broadcast %48 : vector<16x1xf32> to vector<16x256xf32>
      %50 = arith.mulf %25, %49 : vector<16x256xf32>
      %cst_19 = arith.constant dense<0.000000e+00> : vector<256xf32>
      %51 = vector.multi_reduction <add>, %50, %cst_19 [0] : vector<16x256xf32> to vector<256xf32>
      %52 = vector.shape_cast %51 : vector<256xf32> to vector<1x256xf32>
      %53 = arith.subf %42, %47 : vector<1x256xf32>
      %54 = math.exp %53 : vector<1x256xf32>
      %55 = tpu.reciprocal %52 {approx = true} : vector<1x256xf32> -> vector<1x256xf32>
      %56 = arith.mulf %54, %55 : vector<1x256xf32>
      %c0_20 = arith.constant 0 : index
      %c0_21 = arith.constant 0 : index
      %57 = vector.load %arg7[%c0_20, %c0_21] : memref<1x256xf32, #tpu.memory_space<vmem>>, vector<1x256xf32>
      tpu.vector_store %arg7[%c0_20, %c0_21], %56 {strides = array<i32>} : memref<1x256xf32, #tpu.memory_space<vmem>>, vector<1x256xf32>,
      %58 = vector.broadcast %56 : vector<1x256xf32> to vector<16x256xf32>
      %59 = arith.mulf %25, %58 : vector<16x256xf32>
      %60 = arith.truncf %59 : vector<16x256xf32> to vector<16x256xbf16>
      %61 = vector.extract_strided_slice %39 {offsets = [0, 0], sizes = [256, 128], strides = [1, 1]} : vector<256x256xf32> to vector<256x128xf32>
      %62 = arith.truncf %61 : vector<256x128xf32> to vector<256x128xbf16>
      %c0_22 = arith.constant 0 : index
      %c0_23 = arith.constant 0 : index
      %63 = vector.load %arg6[%c0_22, %c0_23] : memref<16x128xf32, #tpu.memory_space<vmem>>, vector<16x128xf32>
      %cst_24 = arith.constant dense<0.000000e+00> : vector<16x128xf32>
      %64 = tpu.matmul %60, %62, %cst_24 {dimension_numbers = #tpu.dot_dimension_numbers<[1], [0], [0], [1], [0, 0, 1, 1], [], []>} : vector<16x256xbf16>, vector<256x128xbf16>, vector<16x128xf32> -> vector<16x128xf32>
      %65 = arith.addf %63, %64 : vector<16x128xf32>
      %c0_25 = arith.constant 0 : index
      %c0_26 = arith.constant 0 : index
      %66 = vector.load %arg6[%c0_25, %c0_26] : memref<16x128xf32, #tpu.memory_space<vmem>>, vector<16x128xf32>
      tpu.vector_store %arg6[%c0_25, %c0_26], %65 {strides = array<i32>} : memref<16x128xf32, #tpu.memory_space<vmem>>, vector<16x128xf32>,
    } else {
    }
    return
  }
  func.func @transform_0(%arg0: i32, %arg1: i32) -> (i32, i32) {
    %c0_i32 = arith.constant 0 : i32
    %c0_i32_0 = arith.constant 0 : i32
    return %c0_i32, %arg1 : i32, i32
  }
  func.func @transform_1(%arg0: i32, %arg1: i32) -> (i32, i32) {
    %c0_i32 = arith.constant 0 : i32
    %c0_i32_0 = arith.constant 0 : i32
    return %arg1, %c0_i32 : i32, i32
  }
  func.func @transform_2(%arg0: i32, %arg1: i32) -> (i32, i32) {
    %c0_i32 = arith.constant 0 : i32
    %c0_i32_0 = arith.constant 0 : i32
    %c0_i32_1 = arith.constant 0 : i32
    return %c0_i32, %c0_i32_0 : i32, i32
  }
  func.func @transform_3(%arg0: i32, %arg1: i32) -> (i32, i32) {
    %c0_i32 = arith.constant 0 : i32
    %c0_i32_0 = arith.constant 0 : i32
    %c0_i32_1 = arith.constant 0 : i32
    return %c0_i32, %c0_i32_0 : i32, i32
  }
  func.func @transform_4(%arg0: i32, %arg1: i32) -> (i32, i32) {
    %c0_i32 = arith.constant 0 : i32
    %c0_i32_0 = arith.constant 0 : i32
    %c0_i32_1 = arith.constant 0 : i32
    return %c0_i32, %c0_i32_0 : i32, i32
  }
  func.func @transform_5(%arg0: i32, %arg1: i32) -> (i32, i32) {
    %c0_i32 = arith.constant 0 : i32
    %c0_i32_0 = arith.constant 0 : i32
    return %c0_i32, %arg1 : i32, i32
  }
}

</mosaic_0001>

<bundles_post_ra>
// kernel: tpu_custom_call.1
= control target key start
LH: loop header
LB: loop body
LE: loop exit
PB: predicated region body
PF: predicated region fallthrough
CT: control target
= control target key end

     0   :  { %11 = vsyncpa [#allocation5], 0  ;;  %s3090_s0 = inlined_call_operand.hbm [shape: s32[1,64], index: 0, kind: input, shape index: {}]   ;;  %s3091_s1 = inlined_call_operand.hbm [shape: bf16[64,128], index: 1, kind: input, shape index: {}]   ;;  %s3092_s2 = inlined_call_operand.hbm [shape: bf16[128,256], index: 2, kind: input, shape index: {}]   ;;  %s3093_s3 = inlined_call_operand.vmem [shape: f32[1,256], index: 3, kind: input, shape index: {}]   ;;  %s3094_s4 = inlined_call_operand.hbm [shape: f32[16,128], index: 4, kind: output, shape index: {0}]   ;;  %s3095_s5 = inlined_call_operand.hbm [shape: f32[1,64], index: 5, kind: output, shape index: {1}]  }
   0x1   :  { %12 = vsyncpa [#allocation8], 0 }
   0x2   :  { %13 = vsyncpa [#allocation6], 0 }
   0x3   :  { %14 = vsyncpa [#allocation12], 0  ;;  %s2381_s18 = smov 0   ;;  %s2383_s19 = smov 0  }
   0x4   :  { %s2385_s20 = smov 0  }
   0x5 LB: > { %s2397_s21 = sadd.s32 4294967295, %s2328_s20   ;;  %s32_s22 = sadd.s32 1, %s2324_s19  ;;  %s2328_s20 = sphi %s2385_s20, %s20_s20   ;;  %s2324_s19 = sphi %s2383_s19, %s3134_s19   ;;  %s2320_s18 = sphi %s2381_s18, %s3133_s18  }
   0x6   : > { %p34_p0 = scmp.ge.s32.totalorder %s32_s22, 2  ;;  %p1850_p1 = scmp.ge.s32.totalorder %s2328_s20, 1 }
   0x7   : > { %p178_p2 = scmp.lt.s32.totalorder %s2328_s20, 3 }
   0x8   : > { %s3136_s22 = smov (%p34_p0, %s32_s22), 0 }
   0x9   : > { %p2404_p3 = pnand %p1850_p1, %p178_p2 }
   0xa   : > { %p1851_p4 = scmp.ne.s32.totalorder (!%p2404_p3), %s2397_s21, 0 }
   0xb   : > { %182 = sbr.rel (%p2404_p3) target bundleno = 90 (0x5a), region = 12 }
  0x12   : > { %186 = sbr.rel (%p1851_p4) target bundleno = 42 (0x2a), region = 16 }
  0x19   : > { %192 = vsyncadd [#allocation5], 16  ;;  %s2330_s24 = smov [#allocation4]   ;;  %s2172_s28 = scalar_lea.hbm %s3090_s0, 16 }
  0x1a   : > { %s197_s25 = sshll.u32 %s2330_s24, 4  ;;  %p2173_p5 = scmp.ne.s32.totalorder %s3090_s0, %s2172_s28  ;;  %s198_s25 = int_to_ptr.vmem [resolvable:$true] %s197_s25 }
  0x1b   : > { %p2176_p6 = scmp.lt.u32.totalorder %s2172_s28, %s3090_s0 }
  0x1d   : > { %p2178_p7 = pnand %p2176_p6, %p2173_p5 }
  0x1f   : > { %2181 = shalt.err (!%p2178_p7)
}
  0x20   : > { %s2182_s8 = scalar_lea.vmem %s198_s25, 16  ;;  %s2186_s9 = scalar_lea.vmem %s198_s25, 32 }
  0x21   : > { %p2183_p8 = scmp.ne.s32.totalorder %s198_s25, %s2182_s8  ;;  %p2187_p9 = scmp.lt.s32.totalorder %s198_s25, %s198_s25 }
  0x22   : > { %p2188_p10 = scmp.lt.s32.totalorder %s2186_s9, %s2182_s8 }
  0x24   : > { %p2189_p11 = por %p2188_p10, %p2187_p9 }
  0x26   : > { %p2190_p12 = pnand %p2189_p11, %p2183_p8 }
  0x28   : > { %2193 = shalt.err (!%p2190_p12)
}
  0x29   : > { %200 = dma.hbm_to_vmem [thread:$0]  %s3090_s0, 16, %s198_s25, [#allocation5]  }
  0x2a PF: > { %203 = sbr.rel (%p1851_p4) target bundleno = 67 (0x43), region = 20 }
  0x31   : > { %209 = vsyncadd [#allocation8], 1536  ;;  %s2331_s12 = smov [#allocation7]   ;;  %s2194_s16 = scalar_lea.hbm %s3091_s1, 512 }
  0x32   : > { %s214_s13 = sshll.u32 %s2331_s12, 4  ;;  %p2195_p13 = scmp.ne.s32.totalorder %s3091_s1, %s2194_s16  ;;  %s215_s13 = int_to_ptr.vmem [resolvable:$true] %s214_s13 }
  0x33   : > { %p2198_p0 = scmp.lt.u32.totalorder %s2194_s16, %s3091_s1 }
  0x35   : > { %p2200_p1 = pnand %p2198_p0, %p2195_p13 }
  0x37   : > { %2203 = shalt.err (!%p2200_p1)
}
  0x38   : > { %s2204_s25 = scalar_lea.vmem %s215_s13, 512  ;;  %s2208_s28 = scalar_lea.vmem %s215_s13, 2048 }
  0x39   : > { %p2205_p2 = scmp.ne.s32.totalorder %s215_s13, %s2204_s25  ;;  %p2209_p4 = scmp.lt.s32.totalorder %s215_s13, %s215_s13 }
  0x3a   : > { %p2210_p5 = scmp.lt.s32.totalorder %s2208_s28, %s2204_s25 }
  0x3c   : > { %p2211_p6 = por %p2210_p5, %p2209_p4 }
  0x3e   : > { %p2212_p7 = pnand %p2211_p6, %p2205_p2 }
  0x40   : > { %2215 = shalt.err (!%p2212_p7)
}
  0x41   : > { %s2332_s29 = smov 64   ;;  %s2333_s30 = smov 4  }
  0x42   : > { %220 = dma.hbm_to_vmem [thread:$0]  %s3091_s1, 512, %s215_s13, [#allocation8], %s2332_s29, %s2332_s29, %s2333_s30  }
  0x43 PF: > { %p2067_p8 = scmp.eq.s32.totalorder %s2397_s21, 0  ;;  %s2334_s8 = smov [#allocation9]  }
  0x44   : > { %s227_s9 = sshll.u32 %s2334_s8, 4  ;;  %s2216_s12 = scalar_lea.hbm %s3092_s2, 2048  ;;  %s228_s9 = int_to_ptr.vmem [resolvable:$true] %s227_s9 }
  0x45   : > { %p2217_p9 = scmp.ne.s32.totalorder %s3092_s2, %s2216_s12  ;;  %p2222_p12 = scmp.lt.u32.totalorder %s2216_s12, %s3092_s2 }
  0x47   : > { %p2218_p10 = pnand %p2217_p9, %p2067_p8 }
  0x49   : > { %p2219_p11 = pneg %p2218_p10 }
  0x4b   : > { %p2224_p13 = pnand %p2222_p12, %p2219_p11 }
  0x4d   : > { %2227 = shalt.err (!%p2224_p13)
}
  0x4e   : > { %s2228_s17 = scalar_lea.vmem %s228_s9, 2048  ;;  %p2235_p4 = scmp.lt.s32.totalorder %s228_s9, %s228_s9 }
  0x4f   : > { %p2229_p0 = scmp.ne.s32.totalorder %s228_s9, %s2228_s17  ;;  %p2236_p5 = scmp.lt.s32.totalorder %s2228_s17, %s2228_s17 }
  0x51   : > { %p2230_p1 = pnand %p2229_p0, %p2067_p8  ;;  %p2237_p6 = por %p2236_p5, %p2235_p4 }
  0x53   : > { %p2231_p2 = pneg %p2230_p1 }
  0x55   : > { %p2238_p7 = pnand %p2237_p6, %p2231_p2 }
  0x57   : > { %2241 = shalt.err (!%p2238_p7)
}
  0x58   : > { %s2335_s24 = smov 128   ;;  %s2336_s26 = smov 8  }
  0x59   : > { %2054 = dma.hbm_to_vmem [thread:$0]  (%p2067_p8), %s3092_s2, 2048, %s228_s9, [#allocation8], %s2335_s24, %s2335_s24, %s2336_s26  }
  0x5a PF: > { %246 = sbr.rel (%p2404_p3) target bundleno = 1697 (0x6a1), region = 36 }
  0x61   : > { %p2068_p9 = scmp.eq.s32.totalorder %s2397_s21, 0 }
  0x63   : > { %2303 = dma.done.wait (%p2068_p9), [#allocation5], 32  }
  0x64   : > { %2305 = vsyncadd (%p2068_p9), [#allocation5], 4294967264 }
  0x65   : > { %2307 = dma.done.wait (%p2068_p9), [#allocation8], 4096  }
  0x66   : > { %2309 = vsyncadd (%p2068_p9), [#allocation8], 4294963200  ;;  %v3096_v0 = vlaneseq  ;;  %v291_v4 = vld [vmem:[#allocation4] sm:$0x3]  ;;  %v399_v5 = vld [vmem:[#allocation7] sm:$0xf] }
  0x67   : > { %vm2337_vm1 = vmmov 1   ;;  %vm2338_vm3 = vmmov 0   ;;  %v400_v12 = vld [vmem:[#allocation7 + $0x4] sm:$0xf]  ;;  %v401_v13 = vld [vmem:[#allocation7 + $0x8] sm:$0xf] }
  0x68   : > { %v2462_v1 = vshrl.u32 %v3096_v0, 7  ;;  %v283_v2 = vand.u32 127, %v3096_v0  ;;  %vm2468_vm2 = vmpackc.low %vm2337_vm1, %vm2337_vm1  ;;  %v402_v14 = vld [vmem:[#allocation7 + $0xc] sm:$0xf]  ;;  %v403_v15 = vld [vmem:[#allocation7 + $0x10] sm:$0xf] }
  0x69   : > { %v2475_v9 = vsel %vm2468_vm2, %v399_v5, 0  ;;  %vm2480_vm4 = vmpackc.low %vm2338_vm3, %vm2338_vm3  ;;  %v2339_v17 = vmov 8   ;;  %v404_v19 = vld [vmem:[#allocation7 + $0x14] sm:$0xf]  ;;  %v405_v20 = vld [vmem:[#allocation7 + $0x18] sm:$0xf] }
  0x6a   : > { %v2466_v3 = vsub.s32 0, %v2462_v1  ;;  %vm289_vm0 = vcmp.lt.s32.totalorder %v283_v2, 64  ;;  %v2478_v10 = vadd.s32 8, %v2462_v1  ;;  %v406_v21 = vld [vmem:[#allocation7 + $0x1c] sm:$0xf]  ;;  %v2500_v39 = vsel %vm2468_vm2, %v400_v12, 0 }
  0x6b   : > { %v407_v22 = vld [vmem:[#allocation7 + $0x20] sm:$0xf]  ;;  %v408_v23 = vld [vmem:[#allocation7 + $0x24] sm:$0xf]  ;;  %v409_v24 = vld [vmem:[#allocation7 + $0x28] sm:$0xf] }
  0x6c   : > { %v295_v7 = vrot.slane %v291_v4, %v2466_v3  ;;  %v2488_v18 = vrot.slane %v2339_v17, %v2466_v3  ;;  %v410_v25 = vld [vmem:[#allocation7 + $0x2c] sm:$0xf]  ;;  %v411_v26 = vld [vmem:[#allocation7 + $0x30] sm:$0xf]  ;;  %v412_v27 = vld [vmem:[#allocation7 + $0x34] sm:$0xf] }
  0x6d   : > { %v413_v28 = vld [vmem:[#allocation7 + $0x38] sm:$0xf]  ;;  %v414_v29 = vld [vmem:[#allocation7 + $0x3c] sm:$0xf]  ;;  %v415_v30 = vld [vmem:[#allocation7 + $0x40] sm:$0xf] }
  0x6e   : > { %v300_v8 = vsel %vm289_vm0, %v295_v7, 8  ;;  %v416_v31 = vld [vmem:[#allocation7 + $0x44] sm:$0xf]  ;;  %v417_v32 = vld [vmem:[#allocation7 + $0x48] sm:$0xf]  ;;  %vm568_vm6 = vcmp.eq.s32.totalorder %v2488_v18, %v2462_v1  ;;  %vm570_vm8 = vcmp.eq.s32.totalorder %v2488_v18, %v2478_v10  ;;  %v2504_v40 = vsel %vm2468_vm2, %v401_v13, 0 }
  0x6f   : > { %v2485_v16 = vrot.slane %v300_v8, %v2466_v3  ;;  %v418_v33 = vld [vmem:[#allocation7 + $0x4c] sm:$0xf]  ;;  %v419_v34 = vld [vmem:[#allocation7 + $0x50] sm:$0xf]  ;;  %v420_v35 = vld [vmem:[#allocation7 + $0x54] sm:$0xf] }
  0x70   : > { %v421_v36 = vld [vmem:[#allocation7 + $0x58] sm:$0xf]  ;;  %v422_v37 = vld [vmem:[#allocation7 + $0x5c] sm:$0xf]  ;;  %v423_v38 = vld [vmem:[#allocation7 + $0x60] sm:$0xf] }
  0x71   : > { %vm567_vm5 = vcmp.eq.s32.totalorder %v2485_v16, %v2462_v1  ;;  %vm569_vm7 = vcmp.eq.s32.totalorder %v2485_v16, %v2478_v10  ;;  %v2508_v41 = vsel %vm2468_vm2, %v402_v14, 0  ;;  %v2512_v42 = vsel %vm2468_vm2, %v403_v15, 0  ;;  %v424_v43 = vld [vmem:[#allocation7 + $0x64] sm:$0xf]  ;;  %v425_v44 = vld [vmem:[#allocation7 + $0x68] sm:$0xf] }
  0x72   : > { %v426_v45 = vld [vmem:[#allocation7 + $0x6c] sm:$0xf]  ;;  %v427_v46 = vld [vmem:[#allocation7 + $0x70] sm:$0xf]  ;;  %v2516_v47 = vsel %vm2468_vm2, %v404_v19, 0  ;;  %v2520_v48 = vsel %vm2468_vm2, %v405_v20, 0 }
  0x73   : > { %v2524_v49 = vsel %vm2468_vm2, %v406_v21, 0  ;;  %v2528_v50 = vsel %vm2480_vm4, %v407_v22, 0  ;;  %v428_v51 = vld [vmem:[#allocation7 + $0x74] sm:$0xf]  ;;  %v2532_v52 = vsel %vm2480_vm4, %v408_v23, 0  ;;  %v2536_v53 = vsel %vm2480_vm4, %v409_v24, 0 }
  0x74   : > { %v2540_v54 = vsel %vm2480_vm4, %v410_v25, 0  ;;  %v2544_v55 = vsel %vm2480_vm4, %v411_v26, 0  ;;  %v429_v56 = vld [vmem:[#allocation7 + $0x78] sm:$0xf]  ;;  %v2548_v57 = vsel %vm2480_vm4, %v412_v27, 0  ;;  %v2552_v58 = vsel %vm2480_vm4, %v413_v28, 0 }
  0x75   : > { %3108 = vst [vmem:[#allocation17_spill] sm:$0xff] %v2552_v58  ;;  %v2556_v59 = vsel %vm2480_vm4, %v414_v29, 0  ;;  %v2560_v60 = vsel %vm2480_vm4, %v415_v30, 0  ;;  %v430_v61 = vld [vmem:[#allocation7 + $0x7c] sm:$0xf]  ;;  %v2564_v62 = vsel %vm2480_vm4, %v416_v31, 0 }
  0x76   : > { %3109 = vst [vmem:[#allocation18_spill] sm:$0xff] %v2556_v59  ;;  %3110 = vst [vmem:[#allocation19_spill] sm:$0xff] %v2560_v60  ;;  %v2568_v63 = vsel %vm2480_vm4, %v417_v32, 0  ;;  %v2572_v2 = vsel %vm2480_vm4, %v418_v33, 0  ;;  %v2576_v4 = vsel %vm2480_vm4, %v419_v34, 0  ;;  %v2580_v5 = vsel %vm2480_vm4, %v420_v35, 0 }
  0x77   : > { %3111 = vst [vmem:[#allocation20_spill] sm:$0xff] %v2564_v62  ;;  %v2584_v6 = vsel %vm2480_vm4, %v421_v36, 0  ;;  %v2588_v7 = vsel %vm2480_vm4, %v422_v37, 0  ;;  %v2592_v8 = vsel %vm2480_vm4, %v423_v38, 0  ;;  %v2596_v12 = vsel %vm2480_vm4, %v424_v43, 0  ;;  %p1862_p3 = scmp.ne.s32.totalorder %s2320_s18, 0 }
  0x78   : > { %v2600_v13 = vsel %vm2480_vm4, %v425_v44, 0  ;;  %v2604_v14 = vsel %vm2480_vm4, %v426_v45, 0  ;;  %v2608_v15 = vsel %vm2480_vm4, %v427_v46, 0  ;;  %v2612_v17 = vsel %vm2480_vm4, %v428_v51, 0  ;;  %v2122_v25 = vld [vmem:[#allocation9 + $0x4] ss:$8 sps:$4 sm:$0xff] (!%p1862_p3)  }
  0x79   : > { %v2616_v19 = vsel %vm2480_vm4, %v429_v56, 0  ;;  %v2620_v20 = vsel %vm2480_vm4, %v430_v61, 0  ;;  %v2340_v21 = vmov 0.0   ;;  %582 = sbr.rel (%p1862_p3) target bundleno = 958 (0x3be), region = 52  ;;  %v2123_v26 = vld [vmem:[#allocation9 + $0x14] ss:$8 sps:$4 sm:$0xff] (!%p1862_p3)   ;;  %v1864_v27 = vcombine.low (!%p1862_p3), %v2475_v9, %v2500_v39  ;;  %1973 = vmatprep.subr.bf16.mxu0 (!%p1862_p3), %v2122_v25  ;;  %2021 = vmatprep.subr.bf16.mxu1 (!%p1862_p3), %v2122_v25 }
  0x7a   : > { %3112 = vst [vmem:[#allocation21_spill] sm:$0xff] %v2616_v19  ;;  %3113 = vst [vmem:[#allocation22_spill] sm:$0xff] %v2620_v20  ;;  %v2625_v22 = vsel %vm567_vm5, 1.0, %v2340_v21  ;;  %v2630_v23 = vsel %vm568_vm6, 1.0, %v2340_v21  ;;  %v2635_v24 = vsel %vm569_vm7, 1.0, %v2340_v21  ;;  %v2640_v11 = vsel %vm570_vm8, 1.0, %v2340_v21  ;;  %1974 = vmatpush3.bf16.msra.mxu0 (!%p1862_p3), %v2122_v25  ;;  %2029 = vmatpush3.bf16.msra.mxu1 (!%p1862_p3), %v2122_v25 }
  0x7b   : > { %v1872_v28 = vcombine.low (!%p1862_p3), %v2560_v60, %v2564_v62  ;;  %1975 = vmatprep.subr.bf16.mxu0 (!%p1862_p3), %v2123_v26  ;;  %2022 = vmatprep.subr.bf16.mxu1 (!%p1862_p3), %v2123_v26  ;;  %v2124_v29 = vld [vmem:[#allocation9 + $0x24] ss:$8 sps:$4 sm:$0xff] (!%p1862_p3)   ;;  %v2125_v30 = vld [vmem:[#allocation9 + $0x34] ss:$8 sps:$4 sm:$0xff] (!%p1862_p3)   ;;  %v1865_v35 = vcombine.low (!%p1862_p3), %v2504_v40, %v2508_v41  ;;  %v1873_v36 = vcombine.low (!%p1862_p3), %v2568_v63, %v2572_v2  ;;  %vm587_vm10 = vcmask (!%p1862_p3), 7168  }
  0x7c   : > { %1989 = vmatprep.mubr.bf16.mxu0 (!%p1862_p3), %v1864_v27  ;;  %v2126_v31 = vld [vmem:[#allocation9 + $0x44] ss:$8 sps:$4 sm:$0xff] (!%p1862_p3)   ;;  %v2127_v32 = vld [vmem:[#allocation9 + $0x54] ss:$8 sps:$4 sm:$0xff] (!%p1862_p3)   ;;  %v1866_v37 = vcombine.low (!%p1862_p3), %v2512_v42, %v2516_v47  ;;  %v1874_v38 = vcombine.low (!%p1862_p3), %v2576_v4, %v2580_v5  ;;  %v1867_v43 = vcombine.low (!%p1862_p3), %v2520_v48, %v2524_v49  ;;  %v1875_v44 = vcombine.low (!%p1862_p3), %v2584_v6, %v2588_v7 }
  0x7d   : > { %2005 = vmatprep.mubr.bf16.mxu1 (!%p1862_p3), %v1872_v28  ;;  %v2128_v33 = vld [vmem:[#allocation9 + $0x64] ss:$8 sps:$4 sm:$0xff] (!%p1862_p3)   ;;  %v2129_v34 = vld [vmem:[#allocation9 + $0x74] ss:$8 sps:$4 sm:$0xff] (!%p1862_p3)   ;;  %v1868_v45 = vcombine.low (!%p1862_p3), %v2528_v50, %v2532_v52  ;;  %v1876_v46 = vcombine.low (!%p1862_p3), %v2592_v8, %v2596_v12  ;;  %v1869_v51 = vcombine.low (!%p1862_p3), %v2536_v53, %v2540_v54  ;;  %v1877_v56 = vcombine.low (!%p1862_p3), %v2600_v13, %v2604_v14 }
  0x7e   : > { %1976 = vmatpush3.bf16.msra.mxu0 (!%p1862_p3), %v2123_v26  ;;  %2030 = vmatpush3.bf16.msra.mxu1 (!%p1862_p3), %v2123_v26  ;;  %v1870_v61 = vcombine.low (!%p1862_p3), %v2544_v55, %v2548_v57  ;;  %v1878_v21 = vcombine.low (!%p1862_p3), %v2608_v15, %v2612_v17  ;;  %v1871_v25 = vcombine.low (!%p1862_p3), %v2552_v58, %v2556_v59  ;;  %v2678_v27 = vld [vmem:[%s3093_s3 + $0x1] ss:$0 sm:$0xff] (!%p1862_p3)  ;;  %v2343_v10 = vmov (!%p1862_p3), 0  }
  0x7f   : > { %1977 = vmatprep.subr.bf16.mxu0 (!%p1862_p3), %v2124_v29  ;;  %2023 = vmatprep.subr.bf16.mxu1 (!%p1862_p3), %v2124_v29  ;;  %v1879_v26 = vcombine.low (!%p1862_p3), %v2616_v19, %v2620_v20  ;;  %v2344_v16 = vmov (!%p1862_p3), 0.0  }
  0x80   : > { %591 = vst.msk [vmem:[#allocation3 + $0x8] sm:$0xff] %vm587_vm10, %v2344_v16  ;;  %590 = vst.msk [vmem:[#allocation3] sm:$0xff] %vm587_vm10, %v2344_v16 }
  0x82   : > { %1978 = vmatpush3.bf16.msra.mxu0 %v2124_v29  ;;  %2031 = vmatpush3.bf16.msra.mxu1 %v2124_v29 }
  0x83   : > { %1979 = vmatprep.subr.bf16.mxu0 %v2125_v30  ;;  %2024 = vmatprep.subr.bf16.mxu1 %v2125_v30 }
  0x86   : > { %1980 = vmatpush3.bf16.msra.mxu0 %v2125_v30  ;;  %2032 = vmatpush3.bf16.msra.mxu1 %v2125_v30 }
  0x87   : > { %1981 = vmatprep.subr.bf16.mxu0 %v2126_v31  ;;  %2025 = vmatprep.subr.bf16.mxu1 %v2126_v31 }
  0x8a   : > { %1982 = vmatpush3.bf16.msra.mxu0 %v2126_v31  ;;  %2033 = vmatpush3.bf16.msra.mxu1 %v2126_v31 }
  0x8b   : > { %1983 = vmatprep.subr.bf16.mxu0 %v2127_v32  ;;  %2026 = vmatprep.subr.bf16.mxu1 %v2127_v32 }
  0x8e   : > { %1984 = vmatpush3.bf16.msra.mxu0 %v2127_v32  ;;  %2034 = vmatpush3.bf16.msra.mxu1 %v2127_v32 }
  0x8f   : > { %1985 = vmatprep.subr.bf16.mxu0 %v2128_v33  ;;  %2027 = vmatprep.subr.bf16.mxu1 %v2128_v33 }
  0x92   : > { %1986 = vmatpush3.bf16.msra.mxu0 %v2128_v33  ;;  %2035 = vmatpush3.bf16.msra.mxu1 %v2128_v33 }
  0x93   : > { %1987 = vmatprep.subr.bf16.mxu0 %v2129_v34  ;;  %2028 = vmatprep.subr.bf16.mxu1 %v2129_v34 }
  0x96   : > { %1988 = vmatpush3.bf16.msra.mxu0 %v2129_v34  ;;  %2036 = vmatpush3.bf16.msra.mxu1 %v2129_v34 }
  0x99   : > { %1990 = vmatmul.mubr.bf16.vlgmr.msra.gmra.mrb[0].mxu0 %v1865_v35  ;;  %2006 = vmatmul.mubr.bf16.vlgmr.msra.gmra.mrb[0].mxu1 %v1873_v36 }
  0x9a   : > { %1993 = vmatprep.mubr.bf16.mxu0 %v1866_v37  ;;  %2009 = vmatprep.mubr.bf16.mxu1 %v1874_v38 }
  0xa1   : > { %1994 = vmatmul.mubr.bf16.gmra.mrb[4].mxu0 %v1867_v43  ;;  %2010 = vmatmul.mubr.bf16.gmra.mrb[4].mxu1 %v1875_v44 }
  0xa2   : > { %1997 = vmatprep.mubr.bf16.mxu0 %v1868_v45  ;;  %2013 = vmatprep.mubr.bf16.mxu1 %v1876_v46 }
  0xa9   : > { %1998 = vmatmul.mubr.bf16.gmra.mrb[8].mxu0 %v1869_v51  ;;  %2014 = vmatmul.mubr.bf16.gmra.mrb[8].mxu1 %v1877_v56 }
  0xaa   : > { %2001 = vmatprep.mubr.bf16.mxu0 %v1870_v61  ;;  %2017 = vmatprep.mubr.bf16.mxu1 %v1878_v21 }
  0xb1   : > { %2002 = vmatmul.mubr.bf16.gmra.mrb[12].mxu0 %v1871_v25  ;;  %2018 = vmatmul.mubr.bf16.gmra.mrb[12].mxu1 %v1879_v26 }
 0x16c   : > { %v1991_v28 = vpop.f32.mrb[0].mxu0  ;;  %v2007_v29 = vpop.f32.mrb[0].mxu1 }
 0x16d   : > { %v793_v30 = vpop.f32.mrb[1].mxu0  ;;  %v857_v31 = vpop.f32.mrb[1].mxu1  ;;  %v802_v56 = vadd.f32 %v1991_v28, %v2678_v27  ;;  %v866_v61 = vadd.f32 %v2007_v29, %v2678_v27 }
 0x16e   : > { %v1992_v32 = vpop.f32.mrb[2].mxu0  ;;  %v2008_v33 = vpop.f32.mrb[2].mxu1  ;;  %v858_v34 = vadd.f32 %v2678_v27, %v857_v31  ;;  %v794_v35 = vadd.f32 %v2678_v27, %v793_v30 }
 0x16f   : > { %v796_v36 = vpop.f32.mrb[3].mxu0  ;;  %v860_v37 = vpop.f32.mrb[3].mxu1  ;;  %v805_v31 = vadd.f32 %v1992_v32, %v2678_v27 }
 0x170   : > { %952 = vxpose.xlu1.b32.start [1/16] (narrow) %v858_v34, 8  ;;  %920 = vxpose.xlu0.b32.start [1/16] (narrow) %v794_v35, 8  ;;  %v797_v38 = vadd.f32 %v2678_v27, %v796_v36  ;;  %v861_v43 = vadd.f32 %v2678_v27, %v860_v37  ;;  %v869_v34 = vadd.f32 %v2008_v33, %v2678_v27 }
 0x174   : > { %953 = vxpose.xlu1.b32.cont [2/16] (narrow) %v861_v43, 8  ;;  %921 = vxpose.xlu0.b32.cont [2/16] (narrow) %v797_v38, 8  ;;  %v1995_v44 = vpop.f32.mrb[4].mxu0  ;;  %v2011_v45 = vpop.f32.mrb[4].mxu1 }
 0x175   : > { %v809_v46 = vpop.f32.mrb[5].mxu0  ;;  %v873_v51 = vpop.f32.mrb[5].mxu1 }
 0x176   : > { %v1996_v21 = vpop.f32.mrb[6].mxu0  ;;  %v2012_v25 = vpop.f32.mrb[6].mxu1  ;;  %v810_v35 = vadd.f32 %v2678_v27, %v809_v46  ;;  %v874_v36 = vadd.f32 %v2678_v27, %v873_v51 }
 0x177   : > { %v876_v26 = vpop.f32.mrb[7].mxu1  ;;  %v812_v30 = vpop.f32.mrb[7].mxu0 }
 0x178   : > { %954 = vxpose.xlu1.b32.cont [3/16] (narrow) %v866_v61, 8  ;;  %922 = vxpose.xlu0.b32.cont [3/16] (narrow) %v802_v56, 8  ;;  %v877_v32 = vadd.f32 %v2678_v27, %v876_v26  ;;  %v813_v33 = vadd.f32 %v2678_v27, %v812_v30  ;;  %v821_v26 = vadd.f32 %v1996_v21, %v2678_v27 }
 0x179   : > { %v885_v30 = vadd.f32 %v2012_v25, %v2678_v27 }
 0x17c   : > { %955 = vxpose.xlu1.b32.cont [4/16] (narrow) %v869_v34, 8  ;;  %923 = vxpose.xlu0.b32.cont [4/16] (narrow) %v805_v31, 8  ;;  %v1999_v37 = vpop.f32.mrb[8].mxu0  ;;  %v2015_v28 = vpop.f32.mrb[8].mxu1  ;;  %v818_v31 = vadd.f32 %v1995_v44, %v2678_v27  ;;  %v882_v34 = vadd.f32 %v2011_v45, %v2678_v27 }
 0x17d   : > { %v825_v38 = vpop.f32.mrb[9].mxu0  ;;  %v889_v29 = vpop.f32.mrb[9].mxu1  ;;  %v898_v21 = vadd.f32 %v2015_v28, %v2678_v27 }
 0x17e   : > { %v2000_v43 = vpop.f32.mrb[10].mxu0  ;;  %v2016_v0 = vpop.f32.mrb[10].mxu1 }
 0x17f   : > { %v892_v60 = vpop.f32.mrb[11].mxu1  ;;  %v828_v62 = vpop.f32.mrb[11].mxu0  ;;  %v837_v25 = vadd.f32 %v2000_v43, %v2678_v27 }
 0x180   : > { %956 = vxpose.xlu1.b32.cont [5/16] (narrow) %v874_v36, 8  ;;  %924 = vxpose.xlu0.b32.cont [5/16] (narrow) %v810_v35, 8  ;;  %v826_v35 = vadd.f32 %v2678_v27, %v825_v38  ;;  %v890_v36 = vadd.f32 %v2678_v27, %v889_v29  ;;  %v893_v44 = vadd.f32 %v2678_v27, %v892_v60 }
 0x181   : > { %v829_v45 = vadd.f32 %v2678_v27, %v828_v62  ;;  %v901_v38 = vadd.f32 %v2016_v0, %v2678_v27 }
 0x184   : > { %957 = vxpose.xlu1.b32.cont [6/16] (narrow) %v877_v32, 8  ;;  %925 = vxpose.xlu0.b32.cont [6/16] (narrow) %v813_v33, 8  ;;  %v2003_v46 = vpop.f32.mrb[12].mxu0  ;;  %v2019_v51 = vpop.f32.mrb[12].mxu1  ;;  %v834_v32 = vadd.f32 %v1999_v37, %v2678_v27 }
 0x185   : > { %v841_v56 = vpop.f32.mrb[13].mxu0  ;;  %v905_v61 = vpop.f32.mrb[13].mxu1  ;;  %v850_v37 = vadd.f32 %v2003_v46, %v2678_v27  ;;  %v914_v28 = vadd.f32 %v2019_v51, %v2678_v27 }
 0x186   : > { %v2004_v58 = vpop.f32.mrb[14].mxu0  ;;  %v2020_v59 = vpop.f32.mrb[14].mxu1  ;;  %v842_v29 = vadd.f32 %v2678_v27, %v841_v56  ;;  %v906_v33 = vadd.f32 %v2678_v27, %v905_v61  ;;  %v2341_v56 = vmov 1966171168  }
 0x187   : > { %v908_v19 = vpop.f32.mrb[15].mxu1  ;;  %v844_v20 = vpop.f32.mrb[15].mxu0  ;;  %v853_v0 = vadd.f32 %v2004_v58, %v2678_v27  ;;  %v917_v43 = vadd.f32 %v2020_v59, %v2678_v27  ;;  %v1079_v61 = vunpack.c.l.s4 %v2341_v56 }
 0x188   : > { %958 = vxpose.xlu1.b32.cont [7/16] (narrow) %v882_v34, 8  ;;  %926 = vxpose.xlu0.b32.cont [7/16] (narrow) %v818_v31, 8  ;;  %v909_v60 = vadd.f32 %v2678_v27, %v908_v19  ;;  %v845_v62 = vadd.f32 %v2678_v27, %v844_v20 }
 0x189   : > { %v1080_v31 = vunpack.c.0.s8 %v1079_v61 }
 0x18b   : > { %v1083_v19 = vsub.s32 %v1080_v31, %v2462_v1 }
 0x18c   : > { %959 = vxpose.xlu1.b32.cont [8/16] (narrow) %v885_v30, 8  ;;  %927 = vxpose.xlu0.b32.cont [8/16] (narrow) %v821_v26, 8 }
 0x190   : > { %960 = vxpose.xlu1.b32.cont [9/16] (narrow) %v890_v36, 8  ;;  %928 = vxpose.xlu0.b32.cont [9/16] (narrow) %v826_v35, 8  ;;  %v3114_v35 = vlaneseq }
 0x192   : > { %vm1095_vm9 = vcmp.lt.s32.totalorder %v3114_v35, 256 }
 0x194   : > { %961 = vxpose.xlu1.b32.cont [10/16] (narrow) %v893_v44, 8  ;;  %929 = vxpose.xlu0.b32.cont [10/16] (narrow) %v829_v45, 8 }
 0x198   : > { %962 = vxpose.xlu1.b32.cont [11/16] (narrow) %v898_v21, 8  ;;  %930 = vxpose.xlu0.b32.cont [11/16] (narrow) %v834_v32, 8  ;;  %v2342_v21 = vmov -3e+38  }
 0x199   : > { %589 = vst.msk [vmem:[#allocation2 + $0x8] sm:$0xff] %vm587_vm10, %v2342_v21  ;;  %588 = vst.msk [vmem:[#allocation2] sm:$0xff] %vm587_vm10, %v2342_v21 }
 0x19c   : > { %963 = vxpose.xlu1.b32.cont [12/16] (narrow) %v901_v38, 8  ;;  %931 = vxpose.xlu0.b32.cont [12/16] (narrow) %v837_v25, 8 }
 0x1a0   : > { %964 = vxpose.xlu1.b32.cont [13/16] (narrow) %v906_v33, 8  ;;  %932 = vxpose.xlu0.b32.cont [13/16] (narrow) %v842_v29, 8  ;;  %v1003_v18 = vld [vmem:[#allocation2 + $0x8] sm:$0xff]  ;;  %v1002_v25 = vld [vmem:[#allocation2] sm:$0xff] }
 0x1a4   : > { %965 = vxpose.xlu1.b32.cont [14/16] (narrow) %v909_v60, 8  ;;  %933 = vxpose.xlu0.b32.cont [14/16] (narrow) %v845_v62, 8 }
 0x1a8   : > { %966 = vxpose.xlu1.b32.cont [15/16] (narrow) %v914_v28, 8  ;;  %934 = vxpose.xlu0.b32.cont [15/16] (narrow) %v850_v37, 8 }
 0x1ac   : > { %967 = vxpose.xlu1.b32.end [16/16] (narrow) %v917_v43, 8  ;;  %935 = vxpose.xlu0.b32.end [16/16] (narrow) %v853_v0, 8 }
 0x1ca   : > { %2120 = vset.pattern.permute.xlu1 %v2343_v10 }
 0x1d5   : > { %2121 = vset.pattern.permute.xlu0 %v2343_v10 }
 0x1f0   : > { %v968_v20 = vpop.trf.xlu1  ;;  %v936_v34 = vpop.trf.xlu0 }
 0x1f1   : > { %v991_v26 = vrot.slane %v968_v20, %v2466_v3  ;;  %v987_v46 = vrot.slane %v936_v34, %v2466_v3  ;;  %v1077_v51 = vcombine.low %v936_v34, %v968_v20 }
 0x1f3   : > { %v1084_v30 = vrot.slane %v1077_v51, %v1083_v19  ;;  %v994_v58 = vsel %vm569_vm7, %v987_v46, -3e+38  ;;  %v995_v59 = vsel %vm570_vm8, %v991_v26, -3e+38  ;;  %v992_v27 = vsel %vm567_vm5, %v987_v46, -3e+38 }
 0x1f4   : > { %v999_v36 = vmax.f32 %v994_v58, %v995_v59  ;;  %v993_v44 = vsel %vm568_vm6, %v991_v26, -3e+38 }
 0x1f5   : > { %v1091_v45 = vrot.slane %v1084_v30, %v1083_v19  ;;  %v996_v32 = vmax.f32 %v992_v27, %v993_v44 }
 0x1f6   : > { %1000 = vmax.xlane.f32.xlu1 %v999_v36 }
 0x1f7   : > { %1097 = vst.msk [vmem:[#allocation11] sm:$0x3] %vm1095_vm9, %v1091_v45  ;;  %997 = vmax.xlane.f32.xlu0 %v996_v32 }
 0x283   : > { %v1001_v38 = vpop.xlane.xlu1 %1000 }
 0x284   : > { %v1005_v29 = vmax.f32 %v1003_v18, %v1001_v38  ;;  %v998_v33 = vpop.xlane.xlu0 %997 }
 0x285   : > { %v1004_v60 = vmax.f32 %v1002_v25, %v998_v33 }
 0x286   : > { %v1007_v62 = vsub.f32 %v1003_v18, %v1005_v29  ;;  %1074 = vst.msk [vmem:[#allocation2 + $0x8] sm:$0xff] %vm587_vm10, %v1005_v29  ;;  %1019 = vperm.xlu0 %2121, %v1005_v29  }
 0x287   : > { %v1006_v37 = vsub.f32 %v1002_v25, %v1004_v60  ;;  %1073 = vst.msk [vmem:[#allocation2] sm:$0xff] %vm587_vm10, %v1004_v60  ;;  %1014 = vperm.xlu1 %2120, %v1004_v60  }
 0x305   : > { %v1020_v28 = vpop.permute.xlu0 %1019 }
 0x306   : > { %v1024_v0 = vmul.f32 %v2635_v24, %v1020_v28  ;;  %v1025_v43 = vmul.f32 %v2640_v11, %v1020_v28  ;;  %v1015_v56 = vpop.permute.xlu1 %1014 }
 0x307   : > { %v1022_v61 = vmul.f32 %v2625_v22, %v1015_v56  ;;  %v1023_v31 = vmul.f32 %v2630_v23, %v1015_v56 }
 0x309   : > { %v1026_v19 = vadd.f32 %v1024_v0, %v1022_v61  ;;  %v1033_v26 = vadd.f32 %v1025_v43, %v1023_v31  ;;  %v1010_v61 = vmul.f32 1.442695, %v1007_v62  ;;  %v1008_v31 = vmul.f32 1.442695, %v1006_v37 }
 0x30b   : > { %v1027_v46 = vrot.slane %v1026_v19, 4  ;;  %v1034_v51 = vrot.slane %v1033_v26, 4 }
 0x30d   : > { %v1028_v30 = vadd.f32 %v1027_v46, %v1026_v19  ;;  %v1035_v58 = vadd.f32 %v1034_v51, %v1033_v26  ;;  %v1065_v46 = vld [vmem:[#allocation3 + $0x8] sm:$0xff]  ;;  %v1064_v51 = vld [vmem:[#allocation3] sm:$0xff] }
 0x30f   : > { %v1029_v59 = vrot.slane %v1028_v30, 2  ;;  %v1036_v27 = vrot.slane %v1035_v58, 2 }
 0x311   : > { %v1030_v35 = vadd.f32 %v1029_v59, %v1028_v30  ;;  %v1037_v36 = vadd.f32 %v1036_v27, %v1035_v58 }
 0x313   : > { %v1031_v44 = vrot.slane %v1030_v35, 1  ;;  %v1038_v45 = vrot.slane %v1037_v36, 1 }
 0x315   : > { %v1032_v32 = vadd.f32 %v1031_v44, %v1030_v35  ;;  %v1039_v21 = vadd.f32 %v1038_v45, %v1037_v36 }
 0x317   : > { %v1040_v10 = vsub.f32 %v936_v34, %v1032_v32  ;;  %v1041_v16 = vsub.f32 %v968_v20, %v1039_v21 }
 0x319   : > { %v1042_v18 = vmul.f32 1.442695, %v1040_v10  ;;  %v1044_v25 = vmul.f32 1.442695, %v1041_v16 }
 0x31b   : > { %2130 = vpow2.f32 %v1042_v18 }
 0x31c   : > { %2132 = vpow2.f32 %v1044_v25 }
 0x31d   : > { %2134 = vpow2.f32 %v1010_v61 }
 0x31e   : > { %2136 = vpow2.f32 %v1008_v31 }
 0x325   : > { %v2131_v38 = vpop.eup %2130 }
 0x326   : > { %v2133_v29 = vpop.eup %2132  ;;  %v1049_v33 = vrot.slane %v2131_v38, %v2466_v3 }
 0x327   : > { %v1053_v60 = vrot.slane %v2133_v29, %v2466_v3  ;;  %v2135_v19 = vpop.eup %2134 }
 0x328   : > { %v1056_v28 = vmul.f32 %v2635_v24, %v1049_v33  ;;  %v1054_v0 = vmul.f32 %v2625_v22, %v1049_v33  ;;  %v2137_v26 = vpop.eup %2136  ;;  %v1067_v30 = vmul.f32 %v2135_v19, %v1065_v46 }
 0x329   : > { %v1057_v43 = vmul.f32 %v2640_v11, %v1053_v60  ;;  %v1055_v56 = vmul.f32 %v2630_v23, %v1053_v60  ;;  %v1066_v58 = vmul.f32 %v2137_v26, %v1064_v51 }
 0x32b   : > { %v1061_v34 = vadd.f32 %v1057_v43, %v1056_v28  ;;  %v1058_v20 = vadd.f32 %v1055_v56, %v1054_v0 }
 0x32d   : > { %1062 = vadd.xlane.f32.xlu0 %v1061_v34  ;;  %1059 = vadd.xlane.f32.xlu1 %v1058_v20 }
 0x3ba   : > { %v1063_v59 = vpop.xlane.xlu0 %1062  ;;  %v1060_v27 = vpop.xlane.xlu1 %1059 }
 0x3bb   : > { %v1069_v35 = vadd.f32 %v1067_v30, %v1063_v59  ;;  %v1068_v36 = vadd.f32 %v1066_v58, %v1060_v27 }
 0x3bd   : > { %1072 = vst.msk [vmem:[#allocation3 + $0x8] sm:$0xff] %vm587_vm10, %v1069_v35  ;;  %1071 = vst.msk [vmem:[#allocation3] sm:$0xff] %vm587_vm10, %v1068_v36 }
 0x3be PF: > { %p1888_p8 = scmp.ne.s32.totalorder %s2320_s18, 1 }
 0x3bf   : > { %v2140_v62 = vld [vmem:[#allocation9 + $0x4] ss:$8 sps:$4 sm:$0xff] (!%p1888_p8)   ;;  %v2142_v37 = vld [vmem:[#allocation9] ss:$8 sps:$4 sm:$0xff] (!%p1888_p8)   ;;  %v2345_v44 = vmov (!%p1888_p8), 0   ;;  %v1889_v20 = vcombine.low (!%p1888_p8), %v2475_v9, %v2500_v39  ;;  %v1898_v61 = vcombine.low (!%p1888_p8), %v2568_v63, %v2572_v2  ;;  %v1890_v31 = vcombine.low (!%p1888_p8), %v2504_v40, %v2508_v41  ;;  %v3116_v63 = vld [vmem:[#allocation21_spill] sm:$0xff] (!%p1888_p8) }
 0x3c0   : > { %1101 = sbr.rel (%p1888_p8) target bundleno = 1643 (0x66b), region = 60  ;;  %1344 = vmatprep.mubr.bf16.mxu0 (!%p1888_p8), %v2345_v44  ;;  %1434 = vmatprep.mubr.bf16.mxu1 (!%p1888_p8), %v2345_v44  ;;  %v2143_v45 = vld [vmem:[#allocation9 + $0x14] ss:$8 sps:$4 sm:$0xff] (!%p1888_p8)   ;;  %v2145_v32 = vld [vmem:[#allocation9 + $0x10] ss:$8 sps:$4 sm:$0xff] (!%p1888_p8)   ;;  %v1899_v19 = vcombine.low (!%p1888_p8), %v2576_v4, %v2580_v5  ;;  %v1891_v9 = vcombine.low (!%p1888_p8), %v2512_v42, %v2516_v47  ;;  %v1900_v39 = vcombine.low (!%p1888_p8), %v2584_v6, %v2588_v7  ;;  %v3120_v6 = vld [vmem:[#allocation19_spill] sm:$0xff] (!%p1888_p8) }
 0x3c1   : > { %1312 = vmatprep.subr.bf16.mxu0 (!%p1888_p8), %v2140_v62  ;;  %2037 = vmatprep.subr.bf16.mxu1 (!%p1888_p8), %v2140_v62  ;;  %v2146_v21 = vld [vmem:[#allocation9 + $0x24] ss:$8 sps:$4 sm:$0xff] (!%p1888_p8)   ;;  %v2148_v10 = vld [vmem:[#allocation9 + $0x20] ss:$8 sps:$4 sm:$0xff] (!%p1888_p8)   ;;  %v2149_v16 = vld [vmem:[#allocation9 + $0x34] ss:$8 sps:$4 sm:$0xff] (!%p1888_p8)   ;;  %v1892_v40 = vcombine.low (!%p1888_p8), %v2520_v48, %v2524_v49  ;;  %v1901_v41 = vcombine.low (!%p1888_p8), %v2592_v8, %v2596_v12  ;;  %v1893_v42 = vcombine.low (!%p1888_p8), %v2528_v50, %v2532_v52 }
 0x3c2   : > { %1313 = vmatpush1.bf16.msra.mxu0 (!%p1888_p8), %v2142_v37  ;;  %2045 = vmatpush1.bf16.msra.mxu1 (!%p1888_p8), %v2142_v37  ;;  %v2151_v25 = vld [vmem:[#allocation9 + $0x30] ss:$8 sps:$4 sm:$0xff] (!%p1888_p8)   ;;  %v2152_v38 = vld [vmem:[#allocation9 + $0x44] ss:$8 sps:$4 sm:$0xff] (!%p1888_p8)   ;;  %v2154_v33 = vld [vmem:[#allocation9 + $0x40] ss:$8 sps:$4 sm:$0xff] (!%p1888_p8)   ;;  %v1902_v47 = vcombine.low (!%p1888_p8), %v2600_v13, %v2604_v14  ;;  %v1894_v48 = vcombine.low (!%p1888_p8), %v2536_v53, %v2540_v54  ;;  %v1903_v49 = vcombine.low (!%p1888_p8), %v2608_v15, %v2612_v17 }
 0x3c3   : > { %1314 = vmatprep.subr.bf16.mxu0 (!%p1888_p8), %v2143_v45  ;;  %2038 = vmatprep.subr.bf16.mxu1 (!%p1888_p8), %v2143_v45  ;;  %v2155_v60 = vld [vmem:[#allocation9 + $0x54] ss:$8 sps:$4 sm:$0xff] (!%p1888_p8)   ;;  %v2157_v28 = vld [vmem:[#allocation9 + $0x50] ss:$8 sps:$4 sm:$0xff] (!%p1888_p8)   ;;  %v2158_v0 = vld [vmem:[#allocation9 + $0x64] ss:$8 sps:$4 sm:$0xff] (!%p1888_p8)   ;;  %v1895_v50 = vcombine.low (!%p1888_p8), %v2544_v55, %v2548_v57 }
 0x3c4   : > { %2139 = vset.pattern.permute.xlu1 (!%p1888_p8), %v2345_v44  ;;  %2138 = vset.pattern.permute.xlu0 (!%p1888_p8), %v2345_v44  ;;  %v1599_v18 = vld [vmem:[#allocation3] sm:$0xff] (!%p1888_p8)  ;;  %v1600_v29 = vld [vmem:[#allocation3 + $0x8] sm:$0xff] (!%p1888_p8)  ;;  %v2160_v43 = vld [vmem:[#allocation9 + $0x60] ss:$8 sps:$4 sm:$0xff] (!%p1888_p8)   ;;  %v1132_v57 = vsub.s32 (!%p1888_p8), 1, %v2462_v1 }
 0x3c5   : > { %1603 = vperm.xlu1 (!%p1888_p8), %2139, %v1599_v18   ;;  %v2161_v56 = vld [vmem:[#allocation9 + $0x74] ss:$8 sps:$4 sm:$0xff] (!%p1888_p8)   ;;  %v2163_v34 = vld [vmem:[#allocation9 + $0x70] ss:$8 sps:$4 sm:$0xff] (!%p1888_p8)   ;;  %v1570_v55 = vld [vmem:[#allocation2 + $0x8] sm:$0xff] (!%p1888_p8) }
 0x3c6   : > { %1315 = vmatpush1.bf16.msra.mxu0 (!%p1888_p8), %v2145_v32  ;;  %2046 = vmatpush1.bf16.msra.mxu1 (!%p1888_p8), %v2145_v32  ;;  %v3115_v52 = vld [vmem:[#allocation22_spill] sm:$0xff] (!%p1888_p8)  ;;  %v3118_v54 = vld [vmem:[#allocation17_spill] sm:$0xff] (!%p1888_p8)  ;;  %v3119_v5 = vld [vmem:[#allocation20_spill] sm:$0xff] (!%p1888_p8) }
 0x3c7   : > { %1316 = vmatprep.subr.bf16.mxu0 %v2146_v21  ;;  %2039 = vmatprep.subr.bf16.mxu1 %v2146_v21  ;;  %v1904_v2 = vcombine.low %v3116_v63, %v3115_v52  ;;  %v3117_v53 = vld [vmem:[#allocation18_spill] sm:$0xff]  ;;  %v1897_v7 = vcombine.low %v3120_v6, %v3119_v5  ;;  %v1124_v12 = vld [vmem:[%s3093_s3] sm:$0x3] }
 0x3c8   : > { %v1896_v4 = vcombine.low %v3118_v54, %v3117_v53  ;;  %v1569_v8 = vld [vmem:[#allocation2] sm:$0xff]  ;;  %v2801_v13 = vrot.slane %v1124_v12, %v1132_v57  ;;  %v2804_v14 = vrot.slane %v1124_v12, %v2466_v3 }
 0x3c9   : > { %1608 = vperm.xlu1 %2139, %v1600_v29   ;;  %1573 = vperm.xlu0 %2138, %v1569_v8  }
 0x3ca   : > { %1317 = vmatpush1.bf16.msra.mxu0 %v2148_v10  ;;  %2047 = vmatpush1.bf16.msra.mxu1 %v2148_v10 }
 0x3cb   : > { %1318 = vmatprep.subr.bf16.mxu0 %v2149_v16  ;;  %2040 = vmatprep.subr.bf16.mxu1 %v2149_v16 }
 0x3cd   : > { %1578 = vperm.xlu0 %2138, %v1570_v55  }
 0x3ce   : > { %1319 = vmatpush1.bf16.msra.mxu0 %v2151_v25  ;;  %2048 = vmatpush1.bf16.msra.mxu1 %v2151_v25 }
 0x3cf   : > { %1320 = vmatprep.subr.bf16.mxu0 %v2152_v38  ;;  %2041 = vmatprep.subr.bf16.mxu1 %v2152_v38 }
 0x3d2   : > { %1321 = vmatpush1.bf16.msra.mxu0 %v2154_v33  ;;  %2049 = vmatpush1.bf16.msra.mxu1 %v2154_v33 }
 0x3d3   : > { %1322 = vmatprep.subr.bf16.mxu0 %v2155_v60  ;;  %2042 = vmatprep.subr.bf16.mxu1 %v2155_v60 }
 0x3d6   : > { %1323 = vmatpush1.bf16.msra.mxu0 %v2157_v28  ;;  %2050 = vmatpush1.bf16.msra.mxu1 %v2157_v28 }
 0x3d7   : > { %1324 = vmatprep.subr.bf16.mxu0 %v2158_v0  ;;  %2043 = vmatprep.subr.bf16.mxu1 %v2158_v0 }
 0x3da   : > { %1325 = vmatpush1.bf16.msra.mxu0 %v2160_v43  ;;  %2051 = vmatpush1.bf16.msra.mxu1 %v2160_v43 }
 0x3db   : > { %1326 = vmatprep.subr.bf16.mxu0 %v2161_v56  ;;  %2044 = vmatprep.subr.bf16.mxu1 %v2161_v56 }
 0x3de   : > { %1327 = vmatpush1.bf16.msra.mxu0 %v2163_v34  ;;  %2052 = vmatpush1.bf16.msra.mxu1 %v2163_v34 }
 0x3e1   : > { %1345 = vmatmul.mubr.bf16.vlgmr.msra.gmra.mrb[0].mxu0 %v1889_v20  ;;  %1435 = vmatmul.mubr.bf16.vlgmr.msra.gmra.mrb[0].mxu1 %v1898_v61 }
 0x3e2   : > { %1354 = vmatprep.mubr.bf16.mxu0 %v2345_v44  ;;  %1444 = vmatprep.mubr.bf16.mxu1 %v2345_v44 }
 0x3e9   : > { %1355 = vmatmul.mubr.bf16.gmra.mrb[4].mxu0 %v1890_v31  ;;  %1445 = vmatmul.mubr.bf16.gmra.mrb[4].mxu1 %v1899_v19 }
 0x3ea   : > { %1364 = vmatprep.mubr.bf16.mxu0 %v2345_v44  ;;  %1454 = vmatprep.mubr.bf16.mxu1 %v2345_v44 }
 0x3f1   : > { %1365 = vmatmul.mubr.bf16.gmra.mrb[8].mxu0 %v1891_v9  ;;  %1455 = vmatmul.mubr.bf16.gmra.mrb[8].mxu1 %v1900_v39 }
 0x3f2   : > { %1374 = vmatprep.mubr.bf16.mxu0 %v2345_v44  ;;  %1464 = vmatprep.mubr.bf16.mxu1 %v2345_v44 }
 0x3f9   : > { %1375 = vmatmul.mubr.bf16.gmra.mrb[12].mxu0 %v1892_v40  ;;  %1465 = vmatmul.mubr.bf16.gmra.mrb[12].mxu1 %v1901_v41 }
 0x3fa   : > { %1384 = vmatprep.mubr.bf16.mxu0 %v2345_v44  ;;  %1474 = vmatprep.mubr.bf16.mxu1 %v2345_v44 }
 0x401   : > { %1385 = vmatmul.mubr.bf16.gmra.mrb[16].mxu0 %v1893_v42  ;;  %1475 = vmatmul.mubr.bf16.gmra.mrb[16].mxu1 %v1902_v47 }
 0x402   : > { %1394 = vmatprep.mubr.bf16.mxu0 %v2345_v44  ;;  %1484 = vmatprep.mubr.bf16.mxu1 %v2345_v44 }
 0x409   : > { %1395 = vmatmul.mubr.bf16.gmra.mrb[20].mxu0 %v1894_v48  ;;  %1485 = vmatmul.mubr.bf16.gmra.mrb[20].mxu1 %v1903_v49 }
 0x40a   : > { %1404 = vmatprep.mubr.bf16.mxu0 %v2345_v44  ;;  %1494 = vmatprep.mubr.bf16.mxu1 %v2345_v44 }
 0x411   : > { %1405 = vmatmul.mubr.bf16.gmra.mrb[24].mxu0 %v1895_v50  ;;  %1495 = vmatmul.mubr.bf16.gmra.mrb[24].mxu1 %v1904_v2 }
 0x412   : > { %1414 = vmatprep.mubr.bf16.mxu0 %v2345_v44 }
 0x419   : > { %1415 = vmatmul.mubr.bf16.gmra.mrb[28].mxu0 %v1896_v4 }
 0x41a   : > { %1424 = vmatprep.mubr.bf16.mxu0 %v2345_v44 }
 0x421   : > { %1425 = vmatmul.mubr.bf16.gmra.mrb[32].mxu0 %v1897_v7 }
 0x4b4   : > { %v1346_v15 = vpop.f32.mrb[0].mxu0  ;;  %v1436_v17 = vpop.f32.mrb[0].mxu1 }
 0x4b5   : > { %v1348_v26 = vpop.f32.mrb[1].mxu0  ;;  %v2807_v46 = vadd.f32 %v1436_v17, %v2804_v14  ;;  %v2809_v51 = vpop.f32.mrb[1].mxu1  ;;  %v2813_v27 = vadd.f32 %v1346_v15, %v2804_v14 }
 0x4b6   : > { %v1349_v30 = vadd.f32 %v1348_v26, %v2801_v13  ;;  %v1350_v58 = vpop.f32.mrb[2].mxu0  ;;  %v1440_v59 = vpop.f32.mrb[2].mxu1 }
 0x4b7   : > { %v2816_v35 = vadd.f32 %v1350_v58, %v2804_v14  ;;  %v1352_v36 = vpop.f32.mrb[3].mxu0  ;;  %v2819_v62 = vadd.f32 %v1440_v59, %v2804_v14  ;;  %v2821_v37 = vpop.f32.mrb[3].mxu1 }
 0x4b8   : > { %1505 = vxpose.xlu1.b32.start [1/16] (narrow) %v1349_v30, 8  ;;  %v1353_v32 = vadd.f32 %v1352_v36, %v2801_v13 }
 0x4b9   : > { %v1676_v44 = vpack.c.bf16 %v2816_v35, %v2813_v27 }
 0x4bc   : > { %v1356_v21 = vpop.f32.mrb[4].mxu0  ;;  %1506 = vxpose.xlu1.b32.cont [2/16] (narrow) %v1353_v32, 8  ;;  %v1446_v10 = vpop.f32.mrb[4].mxu1 }
 0x4bd   : > { %v1358_v16 = vpop.f32.mrb[5].mxu0  ;;  %v2829_v18 = vadd.f32 %v1446_v10, %v2804_v14  ;;  %v2831_v25 = vpop.f32.mrb[5].mxu1  ;;  %v2835_v60 = vadd.f32 %v1356_v21, %v2804_v14 }
 0x4be   : > { %v1359_v38 = vadd.f32 %v1358_v16, %v2801_v13  ;;  %v1360_v29 = vpop.f32.mrb[6].mxu0  ;;  %v1450_v33 = vpop.f32.mrb[6].mxu1  ;;  %v1449_v27 = vadd.f32 %v2831_v25, %v2801_v13 }
 0x4bf   : > { %v2838_v28 = vadd.f32 %v1360_v29, %v2804_v14  ;;  %v1362_v0 = vpop.f32.mrb[7].mxu0  ;;  %v2841_v43 = vadd.f32 %v1450_v33, %v2804_v14  ;;  %v2843_v56 = vpop.f32.mrb[7].mxu1 }
 0x4c0   : > { %1507 = vxpose.xlu1.b32.cont [3/16] (narrow) %v1359_v38, 8  ;;  %v1363_v61 = vadd.f32 %v1362_v0, %v2801_v13 }
 0x4c4   : > { %v1366_v31 = vpop.f32.mrb[8].mxu0  ;;  %1508 = vxpose.xlu1.b32.cont [4/16] (narrow) %v1363_v61, 8  ;;  %v1456_v19 = vpop.f32.mrb[8].mxu1 }
 0x4c5   : > { %v1368_v9 = vpop.f32.mrb[9].mxu0  ;;  %v2851_v39 = vadd.f32 %v1456_v19, %v2804_v14  ;;  %v2853_v40 = vpop.f32.mrb[9].mxu1  ;;  %v2857_v48 = vadd.f32 %v1366_v31, %v2804_v14 }
 0x4c6   : > { %v1369_v41 = vadd.f32 %v1368_v9, %v2801_v13  ;;  %v1370_v42 = vpop.f32.mrb[10].mxu0  ;;  %v1460_v47 = vpop.f32.mrb[10].mxu1 }
 0x4c7   : > { %v2860_v49 = vadd.f32 %v1370_v42, %v2804_v14  ;;  %v1372_v50 = vpop.f32.mrb[11].mxu0  ;;  %v2863_v52 = vadd.f32 %v1460_v47, %v2804_v14  ;;  %v2865_v63 = vpop.f32.mrb[11].mxu1 }
 0x4c8   : > { %1509 = vxpose.xlu1.b32.cont [5/16] (narrow) %v1369_v41, 8  ;;  %v1373_v54 = vadd.f32 %v1372_v50, %v2801_v13 }
 0x4c9   : > { %v3125_v35 = vpack.c.bf16 %v2863_v52, %v2851_v39 }
 0x4cc   : > { %v1376_v4 = vpop.f32.mrb[12].mxu0  ;;  %1510 = vxpose.xlu1.b32.cont [6/16] (narrow) %v1373_v54, 8  ;;  %v1466_v5 = vpop.f32.mrb[12].mxu1 }
 0x4cd   : > { %v1378_v6 = vpop.f32.mrb[13].mxu0  ;;  %v2873_v7 = vadd.f32 %v1466_v5, %v2804_v14  ;;  %v2875_v8 = vpop.f32.mrb[13].mxu1  ;;  %v2879_v15 = vadd.f32 %v1376_v4, %v2804_v14 }
 0x4ce   : > { %v1379_v55 = vadd.f32 %v1378_v6, %v2801_v13  ;;  %v1380_v57 = vpop.f32.mrb[14].mxu0  ;;  %v1470_v12 = vpop.f32.mrb[14].mxu1  ;;  %v1469_v39 = vadd.f32 %v2875_v8, %v2801_v13 }
 0x4cf   : > { %v2882_v17 = vadd.f32 %v1380_v57, %v2804_v14  ;;  %v1382_v26 = vpop.f32.mrb[15].mxu0  ;;  %v2885_v30 = vadd.f32 %v1470_v12, %v2804_v14  ;;  %v2887_v58 = vpop.f32.mrb[15].mxu1 }
 0x4d0   : > { %1511 = vxpose.xlu1.b32.cont [7/16] (narrow) %v1379_v55, 8  ;;  %v1383_v32 = vadd.f32 %v1382_v26, %v2801_v13 }
 0x4d4   : > { %v1386_v21 = vpop.f32.mrb[16].mxu0  ;;  %1512 = vxpose.xlu1.b32.cont [8/16] (narrow) %v1383_v32, 8  ;;  %v1476_v10 = vpop.f32.mrb[16].mxu1 }
 0x4d5   : > { %v1388_v16 = vpop.f32.mrb[17].mxu0  ;;  %v2895_v38 = vadd.f32 %v1476_v10, %v2804_v14  ;;  %v2897_v29 = vpop.f32.mrb[17].mxu1  ;;  %v2901_v31 = vadd.f32 %v1386_v21, %v2804_v14 }
 0x4d6   : > { %v1389_v33 = vadd.f32 %v1388_v16, %v2801_v13  ;;  %v1390_v0 = vpop.f32.mrb[18].mxu0  ;;  %v1480_v61 = vpop.f32.mrb[18].mxu1 }
 0x4d7   : > { %v2904_v19 = vadd.f32 %v1390_v0, %v2804_v14  ;;  %v1392_v9 = vpop.f32.mrb[19].mxu0  ;;  %v2907_v41 = vadd.f32 %v1480_v61, %v2804_v14  ;;  %v2909_v42 = vpop.f32.mrb[19].mxu1 }
 0x4d8   : > { %1513 = vxpose.xlu1.b32.cont [9/16] (narrow) %v1389_v33, 8  ;;  %v1393_v54 = vadd.f32 %v1392_v9, %v2801_v13 }
 0x4d9   : > { %v3128_v25 = vpack.c.bf16 %v2904_v19, %v2901_v31 }
 0x4dc   : > { %v1396_v4 = vpop.f32.mrb[20].mxu0  ;;  %1514 = vxpose.xlu1.b32.cont [10/16] (narrow) %v1393_v54, 8  ;;  %v1486_v5 = vpop.f32.mrb[20].mxu1 }
 0x4dd   : > { %v1398_v6 = vpop.f32.mrb[21].mxu0  ;;  %v2917_v55 = vadd.f32 %v1486_v5, %v2804_v14  ;;  %v2919_v57 = vpop.f32.mrb[21].mxu1  ;;  %v2923_v21 = vadd.f32 %v1396_v4, %v2804_v14 }
 0x4de   : > { %v1399_v12 = vadd.f32 %v1398_v6, %v2801_v13  ;;  %v1400_v26 = vpop.f32.mrb[22].mxu0  ;;  %v1490_v32 = vpop.f32.mrb[22].mxu1  ;;  %v1489_v52 = vadd.f32 %v2919_v57, %v2801_v13 }
 0x4df   : > { %v2926_v10 = vadd.f32 %v1400_v26, %v2804_v14  ;;  %v1402_v16 = vpop.f32.mrb[23].mxu0  ;;  %v2929_v33 = vadd.f32 %v1490_v32, %v2804_v14  ;;  %v2931_v0 = vpop.f32.mrb[23].mxu1 }
 0x4e0   : > { %1515 = vxpose.xlu1.b32.cont [11/16] (narrow) %v1399_v12, 8  ;;  %v1403_v54 = vadd.f32 %v1402_v16, %v2801_v13 }
 0x4e4   : > { %v1406_v4 = vpop.f32.mrb[24].mxu0  ;;  %1516 = vxpose.xlu1.b32.cont [12/16] (narrow) %v1403_v54, 8  ;;  %v1496_v5 = vpop.f32.mrb[24].mxu1 }
 0x4e5   : > { %v1408_v6 = vpop.f32.mrb[25].mxu0  ;;  %v2939_v26 = vadd.f32 %v1496_v5, %v2804_v14  ;;  %v2941_v32 = vpop.f32.mrb[25].mxu1  ;;  %v1407_v61 = vadd.f32 %v1406_v4, %v2804_v14 }
 0x4e6   : > { %v1409_v50 = vadd.f32 %v1408_v6, %v2801_v13  ;;  %v1410_v12 = vpop.f32.mrb[26].mxu0  ;;  %v1500_v47 = vpop.f32.mrb[26].mxu1 }
 0x4e7   : > { %v1411_v36 = vadd.f32 %v1410_v12, %v2804_v14  ;;  %v1412_v9 = vpop.f32.mrb[27].mxu0  ;;  %v1501_v16 = vadd.f32 %v1500_v47, %v2804_v14  ;;  %v2947_v59 = vpop.f32.mrb[27].mxu1 }
 0x4e8   : > { %1517 = vxpose.xlu1.b32.cont [13/16] (narrow) %v1409_v50, 8  ;;  %v1413_v53 = vadd.f32 %v1412_v9, %v2801_v13  ;;  %v1503_v8 = vadd.f32 %v2947_v59, %v2801_v13 }
 0x4e9   : > { %v1682_v54 = vpack.c.bf16 %v1411_v36, %v1407_v61  ;;  %v1691_v5 = vpack.c.bf16 %v1501_v16, %v2939_v26 }
 0x4ec   : > { %v1416_v2 = vpop.f32.mrb[28].mxu0  ;;  %1518 = vxpose.xlu1.b32.cont [14/16] (narrow) %v1413_v53, 8 }
 0x4ed   : > { %v1418_v6 = vpop.f32.mrb[29].mxu0  ;;  %v1417_v4 = vadd.f32 %v1416_v2, %v2804_v14 }
 0x4ee   : > { %v1419_v20 = vadd.f32 %v1418_v6, %v2801_v13  ;;  %v1420_v34 = vpop.f32.mrb[30].mxu0 }
 0x4ef   : > { %v1421_v12 = vadd.f32 %v1420_v34, %v2804_v14  ;;  %v1422_v45 = vpop.f32.mrb[31].mxu0 }
 0x4f0   : > { %1519 = vxpose.xlu1.b32.cont [15/16] (narrow) %v1419_v20, 8  ;;  %v1423_v50 = vadd.f32 %v1422_v45, %v2801_v13  ;;  %v1439_v20 = vadd.f32 %v2809_v51, %v2801_v13  ;;  %v3121_v45 = vpack.c.bf16 %v2819_v62, %v2807_v46  ;;  %v1443_v51 = vadd.f32 %v2821_v37, %v2801_v13 }
 0x4f1   : > { %v1683_v47 = vpack.c.bf16 %v1421_v12, %v1417_v4  ;;  %v3123_v4 = vpack.c.bf16 %v2841_v43, %v2829_v18  ;;  %v3124_v46 = vpack.c.bf16 %v2860_v49, %v2857_v48  ;;  %v3126_v62 = vpack.c.bf16 %v2882_v17, %v2879_v15  ;;  %v1574_v15 = vpop.permute.xlu0 %1573 }
 0x4f2   : > { %v3127_v37 = vpack.c.bf16 %v2885_v30, %v2873_v7  ;;  %v1459_v18 = vadd.f32 %v2853_v40, %v2801_v13  ;;  %v3131_v43 = vpack.c.bf16 %v2929_v33, %v2917_v55  ;;  %v1473_v40 = vadd.f32 %v2887_v58, %v2801_v13  ;;  %v1604_v30 = vpop.permute.xlu1 %1603 }
 0x4f3   : > { %v1479_v48 = vadd.f32 %v2897_v29, %v2801_v13  ;;  %v1483_v49 = vadd.f32 %v2909_v42, %v2801_v13  ;;  %v1499_v7 = vadd.f32 %v2941_v32, %v2801_v13  ;;  %v1581_v58 = vmul.f32 %v2625_v22, %v1574_v15 }
 0x4f4   : > { %v1426_v36 = vpop.f32.mrb[32].mxu0  ;;  %1520 = vxpose.xlu1.b32.end [16/16] (narrow) %v1423_v50, 8  ;;  %v1611_v19 = vmul.f32 %v2625_v22, %v1604_v30  ;;  %v1612_v59 = vmul.f32 %v2630_v23, %v1604_v30 }
 0x4f5   : > { %v1428_v61 = vpop.f32.mrb[33].mxu0  ;;  %v1427_v53 = vadd.f32 %v1426_v36, %v2804_v14  ;;  %v1579_v17 = vpop.permute.xlu0 %1578 }
 0x4f6   : > { %v1429_v9 = vadd.f32 %v1428_v61, %v2801_v13  ;;  %v1430_v26 = vpop.f32.mrb[34].mxu0  ;;  %v1609_v31 = vpop.permute.xlu1 %1608 }
 0x4f7   : > { %v1431_v16 = vadd.f32 %v1430_v26, %v2804_v14  ;;  %v1432_v6 = vpop.f32.mrb[35].mxu0  ;;  %v3122_v14 = vpack.c.bf16 %v2838_v28, %v2835_v60  ;;  %v3129_v60 = vpack.c.bf16 %v2907_v41, %v2895_v38  ;;  %v3130_v28 = vpack.c.bf16 %v2926_v10, %v2923_v21 }
 0x4f8   : > { %1537 = vxpose.xlu0.b32.start [1/16] (narrow) %v1429_v9, 8  ;;  %v1433_v34 = vadd.f32 %v1432_v6, %v2801_v13  ;;  %v1583_v38 = vmul.f32 %v2635_v24, %v1579_v17  ;;  %v1613_v41 = vmul.f32 %v2635_v24, %v1609_v31  ;;  %v1582_v21 = vmul.f32 %v2630_v23, %v1574_v15 }
 0x4f9   : > { %v1684_v2 = vpack.c.bf16 %v1431_v16, %v1427_v53  ;;  %v1614_v10 = vmul.f32 %v2640_v11, %v1609_v31  ;;  %v3132_v31 = vlaneseq }
 0x4fa   : > { %v1585_v29 = vadd.f32 %v1583_v38, %v1581_v58  ;;  %v1615_v55 = vadd.f32 %v1613_v41, %v1611_v19 }
 0x4fb   : > { %1951 = vmatprep.subr.bf16.mxu1 %v1684_v2  ;;  %vm1659_vm11 = vcmp.lt.s32.totalorder %v3132_v31, 256 }
 0x4fc   : > { %1538 = vxpose.xlu0.b32.cont [2/16] (narrow) %v1433_v34, 8  ;;  %1952 = vmatpush3.bf16.msra.mxu1 %v1676_v44  ;;  %v1453_v44 = vadd.f32 %v2843_v56, %v2801_v13  ;;  %v1463_v56 = vadd.f32 %v2865_v63, %v2801_v13  ;;  %v1493_v63 = vadd.f32 %v2931_v0, %v2801_v13  ;;  %v1586_v42 = vrot.slane %v1585_v29, 4 }
 0x4fd   : > { %1953 = vmatprep.subr.bf16.mxu1 %v3121_v45  ;;  %v1584_v13 = vmul.f32 %v2640_v11, %v1579_v17  ;;  %v1616_v33 = vrot.slane %v1615_v55, 4 }
 0x4fe   : > { %v1587_v57 = vadd.f32 %v1586_v42, %v1585_v29 }
 0x4ff   : > { %v1592_v32 = vadd.f32 %v1584_v13, %v1582_v21 }
 0x500   : > { %1539 = vxpose.xlu0.b32.cont [3/16] (narrow) %v1439_v20, 8  ;;  %1954 = vmatpush3.bf16.msra.mxu1 %v3122_v14  ;;  %v1588_v0 = vrot.slane %v1587_v57, 2 }
 0x501   : > { %1955 = vmatprep.subr.bf16.mxu1 %v3123_v4 }
 0x502   : > { %v1589_v12 = vadd.f32 %v1588_v0, %v1587_v57 }
 0x504   : > { %1540 = vxpose.xlu0.b32.cont [4/16] (narrow) %v1443_v51, 8  ;;  %1956 = vmatpush3.bf16.msra.mxu1 %v3124_v46  ;;  %v1590_v61 = vrot.slane %v1589_v12, 1 }
 0x505   : > { %1957 = vmatprep.subr.bf16.mxu1 %v3125_v35 }
 0x506   : > { %v1591_v16 = vadd.f32 %v1590_v61, %v1589_v12 }
 0x508   : > { %1541 = vxpose.xlu0.b32.cont [5/16] (narrow) %v1449_v27, 8  ;;  %1958 = vmatpush3.bf16.msra.mxu1 %v3126_v62 }
 0x509   : > { %1959 = vmatprep.subr.bf16.mxu1 %v3127_v37 }
 0x50c   : > { %1542 = vxpose.xlu0.b32.cont [6/16] (narrow) %v1453_v44, 8  ;;  %1960 = vmatpush3.bf16.msra.mxu1 %v3128_v25 }
 0x50d   : > { %1961 = vmatprep.subr.bf16.mxu1 %v3129_v60 }
 0x510   : > { %1543 = vxpose.xlu0.b32.cont [7/16] (narrow) %v1459_v18, 8  ;;  %1962 = vmatpush3.bf16.msra.mxu1 %v3130_v28 }
 0x511   : > { %1963 = vmatprep.subr.bf16.mxu1 %v3131_v43  ;;  %v2346_v43 = vmov 1966171168  }
 0x514   : > { %1544 = vxpose.xlu0.b32.cont [8/16] (narrow) %v1463_v56, 8  ;;  %1964 = vmatpush3.bf16.msra.mxu1 %v1682_v54  ;;  %v1622_v54 = vadd.f32 %v1614_v10, %v1612_v59  ;;  %v1643_v56 = vunpack.c.l.s4 %v2346_v43 }
 0x515   : > { %1965 = vmatprep.subr.bf16.mxu1 %v1691_v5  ;;  %v1617_v5 = vadd.f32 %v1616_v33, %v1615_v55 }
 0x516   : > { %v1623_v50 = vrot.slane %v1622_v54, 4 }
 0x517   : > { %v1618_v36 = vrot.slane %v1617_v5, 2 }
 0x518   : > { %1545 = vxpose.xlu0.b32.cont [9/16] (narrow) %v1469_v39, 8  ;;  %1966 = vmatpush3.bf16.msra.mxu1 %v1683_v47  ;;  %v1593_v47 = vrot.slane %v1592_v32, 4  ;;  %v1624_v26 = vadd.f32 %v1623_v50, %v1622_v54 }
 0x519   : > { %v1619_v53 = vadd.f32 %v1618_v36, %v1617_v5 }
 0x51a   : > { %v1594_v9 = vadd.f32 %v1593_v47, %v1592_v32  ;;  %v1625_v34 = vrot.slane %v1624_v26, 2 }
 0x51b   : > { %v1620_v20 = vrot.slane %v1619_v53, 1 }
 0x51c   : > { %1546 = vxpose.xlu0.b32.cont [10/16] (narrow) %v1473_v40, 8  ;;  %v1595_v2 = vrot.slane %v1594_v9, 2  ;;  %v1626_v4 = vadd.f32 %v1625_v34, %v1624_v26  ;;  %v1644_v40 = vunpack.c.0.s8 %v1643_v56 }
 0x51d   : > { %v1621_v51 = vadd.f32 %v1620_v20, %v1619_v53 }
 0x51e   : > { %v1596_v14 = vadd.f32 %v1595_v2, %v1594_v9  ;;  %v1627_v35 = vrot.slane %v1626_v4, 1 }
 0x51f   : > { %2164 = vrcp.f32 %v1621_v51 }
 0x520   : > { %1547 = vxpose.xlu0.b32.cont [11/16] (narrow) %v1479_v48, 8  ;;  %v1597_v46 = vrot.slane %v1596_v14, 1  ;;  %v1628_v37 = vadd.f32 %v1627_v35, %v1626_v4 }
 0x522   : > { %v1598_v62 = vadd.f32 %v1597_v46, %v1596_v14 }
 0x524   : > { %1548 = vxpose.xlu0.b32.cont [12/16] (narrow) %v1483_v49, 8 }
 0x528   : > { %1549 = vxpose.xlu0.b32.cont [13/16] (narrow) %v1489_v52, 8 }
 0x529   : > { %v2165_v60 = vpop.eup %2164 }
 0x52c   : > { %1550 = vxpose.xlu0.b32.cont [14/16] (narrow) %v1493_v63, 8 }
 0x530   : > { %1551 = vxpose.xlu0.b32.cont [15/16] (narrow) %v1499_v7, 8  ;;  %v1647_v7 = vsub.s32 %v1644_v40, %v2462_v1 }
 0x534   : > { %1552 = vxpose.xlu0.b32.end [16/16] (narrow) %v1503_v8, 8 }
 0x538   : > { %v1521_v6 = vpop.trf.xlu1 }
 0x539   : > { %v1629_v45 = vsub.f32 %v1521_v6, %v1591_v16 }
 0x53b   : > { %v1631_v27 = vmul.f32 1.442695, %v1629_v45 }
 0x53d   : > { %2166 = vpow2.f32 %v1631_v27 }
 0x53e   : > { %2168 = vrcp.f32 %v1628_v37 }
 0x547   : > { %v2167_v28 = vpop.eup %2166 }
 0x548   : > { %v1637_v39 = vmul.f32 %v2167_v28, %v2165_v60  ;;  %v2169_v48 = vpop.eup %2168 }
 0x54a   : > { %v1665_v52 = vrot.slane %v1637_v39, %v2466_v3 }
 0x54c   : > { %v1670_v17 = vmul.f32 %v2625_v22, %v1665_v52  ;;  %v1672_v30 = vmul.f32 %v2635_v24, %v1665_v52 }
 0x54e   : > { %v1674_v42 = vpack.c.bf16 %v1672_v30, %v1670_v17 }
 0x578   : > { %v1553_v44 = vpop.trf.xlu0 }
 0x579   : > { %v1630_v18 = vsub.f32 %v1553_v44, %v1598_v62 }
 0x57b   : > { %v1633_v25 = vmul.f32 1.442695, %v1630_v18 }
 0x57d   : > { %2170 = vpow2.f32 %v1633_v25 }
 0x587   : > { %v2171_v49 = vpop.eup %2170 }
 0x588   : > { %v1638_v63 = vmul.f32 %v2171_v49, %v2169_v48 }
 0x58a   : > { %v1641_v8 = vcombine.low %v1637_v39, %v1638_v63  ;;  %v1669_v15 = vrot.slane %v1638_v63, %v2466_v3 }
 0x58c   : > { %v1648_v58 = vrot.slane %v1641_v8, %v1647_v7  ;;  %v1671_v38 = vmul.f32 %v2630_v23, %v1669_v15  ;;  %v1673_v29 = vmul.f32 %v2640_v11, %v1669_v15 }
 0x58e   : > { %v1655_v19 = vrot.slane %v1648_v58, %v1647_v7  ;;  %v1675_v41 = vpack.c.bf16 %v1673_v29, %v1671_v38 }
 0x590   : > { %1661 = vst.msk [vmem:[#allocation11] sm:$0x3] %vm1659_vm11, %v1655_v19  ;;  %1726 = vmatprep.mubr.bf16.mxu1 %v1675_v41 }
 0x591   : > { %1727 = vmatmul.mubr.bf16.vlgmr.msra.gmra.mrb[28].mxu1 %v1674_v42 }
 0x664   : > { %v1967_v1 = vpop.f32.mrb[28].mxu1 }
 0x665   : > { %v1968_v55 = vpop.f32.mrb[29].mxu1 }
 0x666   : > { %v1969_v3 = vadd.f32 %v1968_v55, %v1967_v1  ;;  %v1970_v57 = vpop.f32.mrb[30].mxu1 }
 0x667   : > { %v1971_v22 = vpop.f32.mrb[31].mxu1 }
 0x668   : > { %v1972_v21 = vadd.f32 %v1971_v22, %v1970_v57  ;;  %1737 = vst [vmem:[#allocation10] sm:$0xff] %v1969_v3 }
 0x66a   : > { %1738 = vst [vmem:[#allocation10 + $0x8] sm:$0xff] %v1972_v21 }
 0x66b PF: > { %p1921_p10 = scmp.ne.s32.totalorder %s2397_s21, 1  ;;  %p2071_p11 = scmp.eq.s32.totalorder %s2397_s21, 1 }
 0x66c   : > { %s2347_s30 = smov [#allocation10]  }
 0x66d   : > { %s1745_s6 = sshll.u32 %s2347_s30, 4  ;;  %s1746_s6 = int_to_ptr.vmem [resolvable:$true] %s1745_s6 }
 0x66e   : > { %s2242_s7 = scalar_lea.vmem %s1746_s6, 256  ;;  %p2249_p1 = scmp.lt.s32.totalorder %s1746_s6, %s1746_s6 }
 0x66f   : > { %p2243_p12 = scmp.ne.s32.totalorder %s1746_s6, %s2242_s7  ;;  %p2250_p2 = scmp.lt.s32.totalorder %s2242_s7, %s2242_s7 }
 0x671   : > { %p2244_p13 = pnand %p2243_p12, %p2071_p11  ;;  %p2251_p4 = por %p2250_p2, %p2249_p1 }
 0x673   : > { %p2245_p0 = pneg %p2244_p13 }
 0x675   : > { %p2252_p5 = pnand %p2251_p4, %p2245_p0 }
 0x677   : > { %2255 = shalt.err (!%p2252_p5)
}
 0x678   : > { %s2256_s10 = scalar_lea.hbm %s3094_s4, 256 }
 0x679   : > { %p2257_p6 = scmp.ne.s32.totalorder %s3094_s4, %s2256_s10  ;;  %p2262_p3 = scmp.lt.u32.totalorder %s2256_s10, %s3094_s4 }
 0x67b   : > { %p2258_p7 = pnand %p2257_p6, %p2071_p11 }
 0x67d   : > { %p2259_p9 = pneg %p2258_p7 }
 0x67f   : > { %p2264_p8 = pnand %p2262_p3, %p2259_p9 }
 0x681   : > { %2267 = shalt.err (!%p2264_p8)
}
 0x682   : > { %s2348_s16 = smov 128   ;;  %s2349_s13 = smov 8  }
 0x683   : > { %2062 = dma.vmem_to_hbm [thread:$0]  (%p2071_p11), %s1746_s6, 256, %s3094_s4, [#allocation6], %s2348_s16, %s2348_s16, %s2349_s13  }
 0x684   : > { %1754 = sbr.rel (%p1921_p10) target bundleno = 1693 (0x69d), region = 72 }
 0x68b   : > { %1760 = vsyncadd [#allocation12], 16  ;;  %s2350_s26 = smov [#allocation11]  }
 0x68c   : > { %s1765_s27 = sshll.u32 %s2350_s26, 4  ;;  %s1766_s27 = int_to_ptr.vmem [resolvable:$true] %s1765_s27 }
 0x68d   : > { %s2268_s25 = scalar_lea.vmem %s1766_s27, 16  ;;  %s2272_s23 = scalar_lea.vmem %s1766_s27, 32 }
 0x68e   : > { %p2269_p12 = scmp.ne.s32.totalorder %s1766_s27, %s2268_s25  ;;  %p2273_p13 = scmp.lt.s32.totalorder %s1766_s27, %s1766_s27 }
 0x68f   : > { %p2274_p0 = scmp.lt.s32.totalorder %s2272_s23, %s2268_s25 }
 0x691   : > { %p2275_p1 = por %p2274_p0, %p2273_p13 }
 0x693   : > { %p2276_p2 = pnand %p2275_p1, %p2269_p12 }
 0x695   : > { %2279 = shalt.err (!%p2276_p2)
}
 0x696   : > { %s2280_s29 = scalar_lea.hbm %s3095_s5, 16 }
 0x697   : > { %p2281_p10 = scmp.ne.s32.totalorder %s3095_s5, %s2280_s29  ;;  %p2284_p4 = scmp.lt.u32.totalorder %s2280_s29, %s3095_s5 }
 0x699   : > { %p2286_p5 = pnand %p2284_p4, %p2281_p10 }
 0x69b   : > { %2289 = shalt.err (!%p2286_p5)
}
 0x69c   : > { %1768 = dma.vmem_to_hbm [thread:$0]  %s1766_s27, 16, %s3095_s5, [#allocation12]  }
 0x69d PF: > { %2311 = dma.done.wait (%p2071_p11), [#allocation6], 256  }
 0x69e   : > { %2313 = vsyncadd (%p2071_p11), [#allocation6], 4294967040 }
 0x69f   : > { %2315 = dma.done.wait (%p2071_p11), [#allocation12], 32  }
 0x6a0   : > { %2317 = vsyncadd (%p2071_p11), [#allocation12], 4294967264 }
 0x6a1 PF: > { %s20_s20 = sadd.s32 1, %s2328_s20   ;;  %s3133_s18 = smov %s2324_s19 }
 0x6a2   : > { %p17_p6 = scmp.ge.s32.totalorder %s20_s20, 4   ;;  %s3134_s19 = smov %s3136_s22 }
 0x6a4   :  { %19 = sbr.rel (!%p17_p6) target bundleno = 5 (0x5), region = 100 }
 0x6ab   :  { %1782 = vsyncpa [#allocation5], 1 }
 0x6ac   :  { %1784 = vsyncpa [#allocation5 + $0x1], 1 }
 0x6ad   :  { %1785 = vsyncpa [#allocation8], 1 }
 0x6ae   :  { %1786 = vsyncpa [#allocation6], 1 }
 0x6af   :  { %1788 = vsyncpa [#allocation6 + $0x1], 1 }
 0x6b0   :  { %1789 = vsyncpa [#allocation12], 1 }

</bundles_post_ra>
